<compile_context>
chip_gen: v6e
topology: v6e:2x2x1
jax: 0.10.0
libtpu: 0.0.40
codegen_flags: <defaults>
</compile_context>

<pallas_src>
import jax
import jax.numpy as jnp
import numpy as np
from jax.experimental import pallas as pl
from jax.experimental.pallas import tpu as pltpu


def _interp_matrix(W):
    """(W, 2W) matrix R such that (x @ R) is the 1-D bilinear x2 upsample along
    the last axis (PyTorch align_corners=False semantics, edges clamped)."""
    q = np.arange(2 * W)
    j = q // 2                                   # main source index (weight .75)
    nb = np.where(q % 2 == 0, j - 1, j + 1)      # neighbour        (weight .25)
    nb = np.clip(nb, 0, W - 1)
    R = np.zeros((W, 2 * W), np.float32)
    np.add.at(R, (j, q), 0.75)
    np.add.at(R, (nb, q), 0.25)                  # accumulates to 1.0 at the edges
    return jnp.asarray(R)


def _make_up2_kernel(k):
    """Kernel upsampling k same-shaped NCHW channel-group blocks per grid step."""

    def kernel(*refs):
        r_ref = refs[0]
        in_refs = refs[1:1 + k]
        out_refs = refs[1 + k:]
        R = r_ref[...]                                           # (W, 2W) f32
        for x_ref, o_ref in zip(in_refs, out_refs):
            x = x_ref[0].astype(jnp.float32)                     # (Cb, H, W)
            Cb, H, W = x.shape
            # ---- horizontal pass first: one MXU matmul, half the FLOPs of
            # doing it after the 2x vertical expansion. ----
            xh = jax.lax.dot_general(
                x, R,
                dimension_numbers=(((2,), (0,)), ((), ())),
                precision=jax.lax.Precision.HIGHEST,
                preferred_element_type=jnp.float32)              # (Cb, H, 2W)
            # ---- vertical pass (align_corners=False, scale=2):
            #   out[2m]   = 0.75*xh[m] + 0.25*xh[m-1]  (edge-clamped)
            #   out[2m+1] = 0.75*xh[m] + 0.25*xh[m+1]  (edge-clamped)
            up = jnp.concatenate([xh[:, :1, :], xh[:, :-1, :]], axis=1)
            dn = jnp.concatenate([xh[:, 1:, :], xh[:, -1:, :]], axis=1)
            even = 0.75 * xh + 0.25 * up
            odd = 0.75 * xh + 0.25 * dn
            # Row interleave along the sublane axis (XLU sublane shuffles; lane
            # layout untouched).
            y = jnp.stack([even, odd], axis=2).reshape(Cb, 2 * H, 2 * W)
            o_ref[0] = y.astype(o_ref.dtype)

    return kernel


def _vmem_limit_bytes():
    """Explicit scoped-VMEM limit: ~48 MiB on v7x (64 MiB VMEM), ~96 MiB on
    v5e/v6e (128 MiB), leaving headroom for Mosaic internal scratch."""
    cap = 64 << 20
    try:
        cap = int(getattr(pltpu.get_tpu_info(), "vmem_capacity_bytes", cap))
    except Exception:
        pass
    return max(32 << 20, min(cap - (16 << 20), 96 << 20))


# Conservative per-channel, per-tensor VMEM footprint multiplier (in units of
# H*W*4 bytes): input double-buffered (2x) + output double-buffered (8x) + f32
# temporaries x/xh/up/dn/even/odd/y (~14x, compiler reuses some).
_FOOTPRINT = 24


def _pick_cb(C, H, W, k, N, vmem_limit):
    """Channel-group block size from a VMEM byte budget (no divisibility rule)."""
    budget = int(vmem_limit * 0.55)
    per_chan = _FOOTPRINT * H * W * 4 * k
    cb = max(1, budget // max(1, per_chan))
    cb = min(cb, C)
    # Keep >= 2 blocks along a 'parallel' axis when N == 1 so both TensorCores
    # on v7x get work (harmless on single-TC v5e/v6e).
    if N == 1 and cb >= C and C > 1:
        cb = -(-C // 2)
    return cb


def _upsample_group(xs):
    """One fused pallas_call for k same-shape, same-dtype NCHW feature maps."""
    k = len(xs)
    N, C, H, W = xs[0].shape
    dtype = xs[0].dtype
    vmem_limit = _vmem_limit_bytes()
    Cb = _pick_cb(C, H, W, k, N, vmem_limit)
    R = _interp_matrix(W)

    feat_in = pl.BlockSpec((1, Cb, H, W), lambda n, c: (n, c, 0, 0))
    feat_out = pl.BlockSpec((1, Cb, 2 * H, 2 * W), lambda n, c: (n, c, 0, 0))
    # Constant block index -> the pipeline DMAs R once, not every grid step.
    r_spec = pl.BlockSpec((W, 2 * W), lambda n, c: (0, 0))

    outs = pl.pallas_call(
        _make_up2_kernel(k),
        out_shape=tuple(jax.ShapeDtypeStruct((N, C, 2 * H, 2 * W), dtype)
                        for _ in range(k)),
        grid_spec=pltpu.PrefetchScalarGridSpec(
            num_scalar_prefetch=0,
            grid=(N, pl.cdiv(C, Cb)),
            in_specs=[r_spec] + [feat_in] * k,
            out_specs=[feat_out] * k),
        compiler_params=pltpu.CompilerParams(
            dimension_semantics=("parallel", "parallel"),
            vmem_limit_bytes=vmem_limit),
    )(R, *xs)
    if not isinstance(outs, (list, tuple)):
        outs = (outs,)
    return list(outs)


def upsample_bilinear_x2(x):
    """nn.Upsample(scale_factor=2, mode='bilinear', align_corners=False), NCHW."""
    return _upsample_group([x])[0]


def ed_up(elist, dlist):
    """Pallas equivalent of EDUp.forward: upsample every feature in both lists.
    Same-shaped levels (typically elist[i]/dlist[i]) share one fused kernel."""
    feats = list(elist) + list(dlist)
    groups, order = {}, []
    for idx, f in enumerate(feats):
        key = (tuple(f.shape), jnp.dtype(f.dtype).name)
        if key not in groups:
            groups[key] = []
            order.append(key)
        groups[key].append(idx)
    results = [None] * len(feats)
    for key in order:
        idxs = groups[key]
        outs = _upsample_group([feats[i] for i in idxs])
        for i, o in zip(idxs, outs):
            results[i] = o
    ne = len(elist)
    return results[:ne], results[ne:]


def _upsample_ref(x):
    """Plain-JAX bilinear x2 upsample matching PyTorch align_corners=False."""
    N, C, H, W = x.shape

    def coords(size):
        dst = jnp.arange(2 * size, dtype=jnp.float32)
        src = jnp.maximum((dst + 0.5) / 2.0 - 0.5, 0.0)
        i0 = jnp.clip(jnp.floor(src).astype(jnp.int32), 0, size - 1)
        i1 = jnp.minimum(i0 + 1, size - 1)
        frac = src - i0.astype(jnp.float32)
        return i0, i1, frac

    h0, h1, fh = coords(H)
    w0, w1, fw = coords(W)
    xv = (x[:, :, h0, :] * (1.0 - fh)[None, None, :, None]
          + x[:, :, h1, :] * fh[None, None, :, None])
    return (xv[:, :, :, w0] * (1.0 - fw)[None, None, None, :]
            + xv[:, :, :, w1] * fw[None, None, None, :])


if __name__ == "__main__":
    key = jax.random.PRNGKey(0)
    k1, k2, k3, k4, k5 = jax.random.split(key, 5)

    # Small encoder/decoder-style feature pyramids; matching elist/dlist levels
    # exercise the fused k=2 path, the extra elist level the k=1 path.
    elist = [jax.random.normal(k1, (2, 4, 16, 16), jnp.float32),
             jax.random.normal(k2, (2, 8, 8, 8), jnp.float32),
             jax.random.normal(k3, (2, 16, 8, 8), jnp.float32)]
    dlist = [jax.random.normal(k4, (2, 4, 16, 16), jnp.float32),
             jax.random.normal(k5, (2, 8, 8, 8), jnp.float32)]

    up_elist, up_dlist = ed_up(elist, dlist)
    jax.block_until_ready((up_elist, up_dlist))

    for inp, out in zip(elist + dlist, up_elist + up_dlist):
        ref = _upsample_ref(inp)
        assert out.shape == ref.shape, (out.shape, ref.shape)
        err = float(jnp.max(jnp.abs(out - ref)))
        assert jnp.allclose(out, ref, atol=1e-4, rtol=1e-4), err

    print("KERNEL_OK")
</pallas_src>

<mosaic_0001>
module attributes {stable_mosaic.version = 11 : i64} {
  func.func @kernel(%arg0: i32, %arg1: i32, %arg2: memref<16x32xf32, #tpu.memory_space<vmem>>, %arg3: memref<1x4x16x16xf32, #tpu.memory_space<vmem>>, %arg4: memref<1x4x16x16xf32, #tpu.memory_space<vmem>>, %arg5: memref<1x4x32x32xf32, #tpu.memory_space<vmem>>, %arg6: memref<1x4x32x32xf32, #tpu.memory_space<vmem>>) attributes {dimension_semantics = [#tpu.dimension_semantics<parallel>, #tpu.dimension_semantics<parallel>], iteration_bounds = array<i64: 2, 1>, scalar_prefetch = 0 : i64, scratch_operands = 0 : i64, tpu.core_type = #tpu.core_type<tc>, window_params = [{pipeline_mode = #tpu.pipeline_mode<synchronous>, transform_indices = @transform_0, window_bounds = array<i64: 16, 32>}, {transform_indices = @transform_1, window_bounds = array<i64: 1, 4, 16, 16>}, {transform_indices = @transform_2, window_bounds = array<i64: 1, 4, 16, 16>}, {transform_indices = @transform_3, window_bounds = array<i64: 1, 4, 32, 32>}, {transform_indices = @transform_4, window_bounds = array<i64: 1, 4, 32, 32>}]} {
    %c0 = arith.constant 0 : index
    %c0_0 = arith.constant 0 : index
    %0 = vector.load %arg2[%c0, %c0_0] : memref<16x32xf32, #tpu.memory_space<vmem>>, vector<16x32xf32>
    %c0_1 = arith.constant 0 : index
    %c0_2 = arith.constant 0 : index
    %c0_3 = arith.constant 0 : index
    %c0_4 = arith.constant 0 : index
    %1 = vector.load %arg3[%c0_1, %c0_2, %c0_3, %c0_4] : memref<1x4x16x16xf32, #tpu.memory_space<vmem>>, vector<1x4x16x16xf32>
    %2 = vector.shape_cast %1 : vector<1x4x16x16xf32> to vector<4x16x16xf32>
    %cst = arith.constant dense<0.000000e+00> : vector<4x16x32xf32>
    %3 = tpu.matmul %2, %0, %cst {dimension_numbers = #tpu.dot_dimension_numbers<[2], [0], [0, 1], [1], [0, 0, 0, 1, 1, 1], [], []>, precision = #tpu.contract_precision<fp32>} : vector<4x16x16xf32>, vector<16x32xf32>, vector<4x16x32xf32> -> vector<4x16x32xf32>
    %4 = vector.extract_strided_slice %3 {offsets = [0, 0, 0], sizes = [4, 1, 32], strides = [1, 1, 1]} : vector<4x16x32xf32> to vector<4x1x32xf32>
    %5 = vector.extract_strided_slice %3 {offsets = [0, 0, 0], sizes = [4, 15, 32], strides = [1, 1, 1]} : vector<4x16x32xf32> to vector<4x15x32xf32>
    %6 = tpu.concatenate %4, %5 in 1 : vector<4x1x32xf32>, vector<4x15x32xf32> -> vector<4x16x32xf32>
    %7 = vector.extract_strided_slice %3 {offsets = [0, 1, 0], sizes = [4, 15, 32], strides = [1, 1, 1]} : vector<4x16x32xf32> to vector<4x15x32xf32>
    %8 = vector.extract_strided_slice %3 {offsets = [0, 15, 0], sizes = [4, 1, 32], strides = [1, 1, 1]} : vector<4x16x32xf32> to vector<4x1x32xf32>
    %9 = tpu.concatenate %7, %8 in 1 : vector<4x15x32xf32>, vector<4x1x32xf32> -> vector<4x16x32xf32>
    %cst_5 = arith.constant 7.500000e-01 : f32
    %10 = vector.broadcast %cst_5 : f32 to vector<4x16x32xf32>
    %11 = arith.mulf %10, %3 : vector<4x16x32xf32>
    %cst_6 = arith.constant 2.500000e-01 : f32
    %12 = vector.broadcast %cst_6 : f32 to vector<4x16x32xf32>
    %13 = arith.mulf %12, %6 : vector<4x16x32xf32>
    %14 = arith.addf %11, %13 : vector<4x16x32xf32>
    %cst_7 = arith.constant 7.500000e-01 : f32
    %15 = vector.broadcast %cst_7 : f32 to vector<4x16x32xf32>
    %16 = arith.mulf %15, %3 : vector<4x16x32xf32>
    %cst_8 = arith.constant 2.500000e-01 : f32
    %17 = vector.broadcast %cst_8 : f32 to vector<4x16x32xf32>
    %18 = arith.mulf %17, %9 : vector<4x16x32xf32>
    %19 = arith.addf %16, %18 : vector<4x16x32xf32>
    %20 = vector.shape_cast %14 : vector<4x16x32xf32> to vector<4x16x1x32xf32>
    %21 = vector.shape_cast %19 : vector<4x16x32xf32> to vector<4x16x1x32xf32>
    %22 = tpu.concatenate %20, %21 in 2 : vector<4x16x1x32xf32>, vector<4x16x1x32xf32> -> vector<4x16x2x32xf32>
    %23 = vector.shape_cast %22 : vector<4x16x2x32xf32> to vector<4x32x32xf32>
    %c0_9 = arith.constant 0 : index
    %c0_10 = arith.constant 0 : index
    %c0_11 = arith.constant 0 : index
    %c0_12 = arith.constant 0 : index
    %24 = vector.load %arg5[%c0_9, %c0_10, %c0_11, %c0_12] : memref<1x4x32x32xf32, #tpu.memory_space<vmem>>, vector<1x4x32x32xf32>
    %25 = vector.shape_cast %24 : vector<1x4x32x32xf32> to vector<4x32x32xf32>
    %26 = vector.shape_cast %23 : vector<4x32x32xf32> to vector<1x4x32x32xf32>
    tpu.vector_store %arg5[%c0_9, %c0_10, %c0_11, %c0_12], %26 {strides = array<i32>} : memref<1x4x32x32xf32, #tpu.memory_space<vmem>>, vector<1x4x32x32xf32>,
    %c0_13 = arith.constant 0 : index
    %c0_14 = arith.constant 0 : index
    %c0_15 = arith.constant 0 : index
    %c0_16 = arith.constant 0 : index
    %27 = vector.load %arg4[%c0_13, %c0_14, %c0_15, %c0_16] : memref<1x4x16x16xf32, #tpu.memory_space<vmem>>, vector<1x4x16x16xf32>
    %28 = vector.shape_cast %27 : vector<1x4x16x16xf32> to vector<4x16x16xf32>
    %cst_17 = arith.constant dense<0.000000e+00> : vector<4x16x32xf32>
    %29 = tpu.matmul %28, %0, %cst_17 {dimension_numbers = #tpu.dot_dimension_numbers<[2], [0], [0, 1], [1], [0, 0, 0, 1, 1, 1], [], []>, precision = #tpu.contract_precision<fp32>} : vector<4x16x16xf32>, vector<16x32xf32>, vector<4x16x32xf32> -> vector<4x16x32xf32>
    %30 = vector.extract_strided_slice %29 {offsets = [0, 0, 0], sizes = [4, 1, 32], strides = [1, 1, 1]} : vector<4x16x32xf32> to vector<4x1x32xf32>
    %31 = vector.extract_strided_slice %29 {offsets = [0, 0, 0], sizes = [4, 15, 32], strides = [1, 1, 1]} : vector<4x16x32xf32> to vector<4x15x32xf32>
    %32 = tpu.concatenate %30, %31 in 1 : vector<4x1x32xf32>, vector<4x15x32xf32> -> vector<4x16x32xf32>
    %33 = vector.extract_strided_slice %29 {offsets = [0, 1, 0], sizes = [4, 15, 32], strides = [1, 1, 1]} : vector<4x16x32xf32> to vector<4x15x32xf32>
    %34 = vector.extract_strided_slice %29 {offsets = [0, 15, 0], sizes = [4, 1, 32], strides = [1, 1, 1]} : vector<4x16x32xf32> to vector<4x1x32xf32>
    %35 = tpu.concatenate %33, %34 in 1 : vector<4x15x32xf32>, vector<4x1x32xf32> -> vector<4x16x32xf32>
    %cst_18 = arith.constant 7.500000e-01 : f32
    %36 = vector.broadcast %cst_18 : f32 to vector<4x16x32xf32>
    %37 = arith.mulf %36, %29 : vector<4x16x32xf32>
    %cst_19 = arith.constant 2.500000e-01 : f32
    %38 = vector.broadcast %cst_19 : f32 to vector<4x16x32xf32>
    %39 = arith.mulf %38, %32 : vector<4x16x32xf32>
    %40 = arith.addf %37, %39 : vector<4x16x32xf32>
    %cst_20 = arith.constant 7.500000e-01 : f32
    %41 = vector.broadcast %cst_20 : f32 to vector<4x16x32xf32>
    %42 = arith.mulf %41, %29 : vector<4x16x32xf32>
    %cst_21 = arith.constant 2.500000e-01 : f32
    %43 = vector.broadcast %cst_21 : f32 to vector<4x16x32xf32>
    %44 = arith.mulf %43, %35 : vector<4x16x32xf32>
    %45 = arith.addf %42, %44 : vector<4x16x32xf32>
    %46 = vector.shape_cast %40 : vector<4x16x32xf32> to vector<4x16x1x32xf32>
    %47 = vector.shape_cast %45 : vector<4x16x32xf32> to vector<4x16x1x32xf32>
    %48 = tpu.concatenate %46, %47 in 2 : vector<4x16x1x32xf32>, vector<4x16x1x32xf32> -> vector<4x16x2x32xf32>
    %49 = vector.shape_cast %48 : vector<4x16x2x32xf32> to vector<4x32x32xf32>
    %c0_22 = arith.constant 0 : index
    %c0_23 = arith.constant 0 : index
    %c0_24 = arith.constant 0 : index
    %c0_25 = arith.constant 0 : index
    %50 = vector.load %arg6[%c0_22, %c0_23, %c0_24, %c0_25] : memref<1x4x32x32xf32, #tpu.memory_space<vmem>>, vector<1x4x32x32xf32>
    %51 = vector.shape_cast %50 : vector<1x4x32x32xf32> to vector<4x32x32xf32>
    %52 = vector.shape_cast %49 : vector<4x32x32xf32> to vector<1x4x32x32xf32>
    tpu.vector_store %arg6[%c0_22, %c0_23, %c0_24, %c0_25], %52 {strides = array<i32>} : memref<1x4x32x32xf32, #tpu.memory_space<vmem>>, vector<1x4x32x32xf32>,
    return
  }
  func.func @transform_0(%arg0: i32, %arg1: i32) -> (i32, i32) {
    %c0_i32 = arith.constant 0 : i32
    %c0_i32_0 = arith.constant 0 : i32
    %c0_i32_1 = arith.constant 0 : i32
    return %c0_i32, %c0_i32_0 : i32, i32
  }
  func.func @transform_1(%arg0: i32, %arg1: i32) -> (i32, i32, i32, i32) {
    %c0_i32 = arith.constant 0 : i32
    %c0_i32_0 = arith.constant 0 : i32
    %c0_i32_1 = arith.constant 0 : i32
    return %arg0, %arg1, %c0_i32, %c0_i32_0 : i32, i32, i32, i32
  }
  func.func @transform_2(%arg0: i32, %arg1: i32) -> (i32, i32, i32, i32) {
    %c0_i32 = arith.constant 0 : i32
    %c0_i32_0 = arith.constant 0 : i32
    %c0_i32_1 = arith.constant 0 : i32
    return %arg0, %arg1, %c0_i32, %c0_i32_0 : i32, i32, i32, i32
  }
  func.func @transform_3(%arg0: i32, %arg1: i32) -> (i32, i32, i32, i32) {
    %c0_i32 = arith.constant 0 : i32
    %c0_i32_0 = arith.constant 0 : i32
    %c0_i32_1 = arith.constant 0 : i32
    return %arg0, %arg1, %c0_i32, %c0_i32_0 : i32, i32, i32, i32
  }
  func.func @transform_4(%arg0: i32, %arg1: i32) -> (i32, i32, i32, i32) {
    %c0_i32 = arith.constant 0 : i32
    %c0_i32_0 = arith.constant 0 : i32
    %c0_i32_1 = arith.constant 0 : i32
    return %arg0, %arg1, %c0_i32, %c0_i32_0 : i32, i32, i32, i32
  }
}

</mosaic_0001>

<bundles_post_ra>
// kernel: tpu_custom_call.1
= control target key start
LH: loop header
LB: loop body
LE: loop exit
PB: predicated region body
PF: predicated region fallthrough
CT: control target
= control target key end

     0   :  { %10 = vsyncpa [#allocation3], 0  ;;  %s7805_s0 = inlined_call_operand.hbm [shape: f32[16,32], index: 0, kind: input, shape index: {}]   ;;  %s7806_s1 = inlined_call_operand.hbm [shape: f32[2,4,16,16], index: 1, kind: input, shape index: {}]   ;;  %s7807_s2 = inlined_call_operand.hbm [shape: f32[2,4,16,16], index: 2, kind: input, shape index: {}]   ;;  %s7808_s3 = inlined_call_operand.hbm [shape: f32[2,4,32,32], index: 3, kind: output, shape index: {0}]   ;;  %s7809_s4 = inlined_call_operand.hbm [shape: f32[2,4,32,32], index: 4, kind: output, shape index: {1}]  }
   0x1   :  { %11 = vsyncpa [#allocation6], 0 }
   0x2   :  { %13 = vsyncpa [#allocation6 + $0x1], 0 }
   0x3   :  { %14 = vsyncpa [#allocation4], 0 }
   0x4   :  { %16 = vsyncpa [#allocation4 + $0x1], 0 }
   0x5   :  { %17 = vsyncpa [#allocation10], 0 }
   0x6   :  { %19 = vsyncpa [#allocation10 + $0x1], 0  ;;  %s6185_s15 = smov 0   ;;  %s6187_s16 = smov 0  }
   0x7   :  { %s6189_s17 = smov 0   ;;  %s6191_s18 = smov 0  }
   0x8   :  { %s6193_s19 = smov 0   ;;  %s6195_s20 = smov 0  }
   0x9 LB: > { %s37_s21 = sadd.s32 1, %s6143_s19  ;;  %s67_s22 = sadd.s32 1, %s6135_s17  ;;  %s6147_s20 = sphi %s6195_s20, %s25_s20   ;;  %s6143_s19 = sphi %s6193_s19, %s7879_s19   ;;  %s6139_s18 = sphi %s6191_s18, %s7878_s18   ;;  %s6135_s17 = sphi %s6189_s17, %s7877_s17   ;;  %s6131_s16 = sphi %s6187_s16, %s7876_s16   ;;  %s6127_s15 = sphi %s6185_s15, %s7875_s15  }
   0xa   : > { %p39_p0 = scmp.ge.s32.totalorder %s37_s21, 2  ;;  %p74_p1 = scmp.ne.s32.totalorder %s6135_s17, %s6131_s16 }
   0xb   : > { %p75_p2 = scmp.eq.s32.totalorder %s6147_s20, 0  ;;  %p5893_p6 = scmp.lt.s32.totalorder %s6147_s20, 2 }
   0xc   : > { %s7881_s21 = smov (%p39_p0, %s37_s21), 0  ;;  %s201_s25 = sand.u32 1, %s6147_s20  }
   0xd   : > { %p6225_p3 = por %p75_p2, %p74_p1  ;;  %s62_s24 = ssub.s32 %s6143_s19, %s7881_s21 }
   0xe   : > { %p65_p5 = scmp.eq.s32.totalorder %s62_s24, 0  ;;  %s203_s26 = sand.u32 1, %s6135_s17  }
   0xf   : > { %s6238_s28 = sshll.u32 %s203_s26, 6  ;;  %s5546_s29 = sshll.u32 %s6143_s19, 10 }
  0x10   : > { %s6236_s27 = scalar_select %p65_p5, %s6135_s17, %s67_s22  }
  0x11   : > { %s214_s6 = scalar_lea.hbm %s7806_s1, %s5546_s29  ;;  %s205_s7 = scalar_lea.vmem [#allocation5], %s6238_s28 }
  0x12   : > { %s215_s8 = sshll.u32 %s205_s7, 4  ;;  %p6247_p7 = pnand %p5893_p6, %p6225_p3  ;;  %s216_s8 = int_to_ptr.vmem [resolvable:$true] %s215_s8 }
  0x13   : > { %s6254_s12 = scalar_lea.hbm %s7807_s2, %s5546_s29  ;;  %s6256_s13 = scalar_lea.sflag [#allocation6], %s201_s25 }
  0x14   : > { %p5953_p8 = pneg %p6247_p7  ;;  %s5964_s14 = scalar_lea.vmem %s216_s8, 1024 }
  0x15   : > { %p5965_p9 = scmp.ne.s32.totalorder %s216_s8, %s5964_s14  ;;  %s6149_s22 = smov [#allocation5]  }
  0x16   : > { %s5969_s23 = sshll.u32 %s6149_s22, 4  ;;  %s5970_s23 = int_to_ptr.vmem [resolvable:$false] %s5969_s23 }
  0x17   : > { %p5967_p10 = pnand %p5965_p9, %p5953_p8  ;;  %s5971_s24 = scalar_lea.vmem %s5970_s23, 2048 }
  0x18   : > { %p5972_p12 = scmp.lt.s32.totalorder %s216_s8, %s5970_s23  ;;  %p5973_p13 = scmp.lt.s32.totalorder %s5971_s24, %s5964_s14 }
  0x19   : > { %p5968_p11 = pneg %p5967_p10 }
  0x1a   : > { %p5974_p0 = por %p5973_p13, %p5972_p12 }
  0x1c   : > { %p5975_p2 = pnand %p5974_p0, %p5968_p11 }
  0x1e   : > { %5978 = shalt.err (!%p5975_p2)
}
  0x1f   : > { %s6150_s26 = smov 128   ;;  %s6151_s25 = smov 8  }
  0x20   : > { %5881 = dma.hbm_to_vmem [thread:$0]  (!%p6247_p7), %s214_s6, 1024, %s216_s8, %s6256_s13, %s6150_s26, %s6150_s26, %s6151_s25  }
  0x21   : > { %s229_s29 = scalar_lea.vmem [#allocation7], %s6238_s28  ;;  %s6271_s5 = sadd.s32 4294967295, %s6147_s20  }
  0x22   : > { %s239_s30 = sshll.u32 %s229_s29, 4  ;;  %s5522_s7 = sadd.s32 4294967294, %s6147_s20   ;;  %s240_s30 = int_to_ptr.vmem [resolvable:$true] %s239_s30 }
  0x23   : > { %p80_p3 = scmp.ne.s32.totalorder %s6131_s16, %s6127_s15  ;;  %p7810_p5 = scmp.eq.s32.totalorder %s6271_s5, 0 }
  0x24   : > { %p134_p6 = scmp.eq.s32.totalorder %s6271_s5, 1  ;;  %p140_p9 = scmp.eq.s32.totalorder %s5522_s7, 1 }
  0x25   : > { %p5523_p10 = scmp.ge.s32.totalorder %s6147_s20, 1  ;;  %p6281_p11 = por %p7810_p5, %p80_p3 }
  0x26   : > { %p6288_p12 = por %p134_p6, %p74_p1  ;;  %p6292_p13 = por %p140_p9, %p80_p3 }
  0x27   : > { %p175_p0 = scmp.lt.s32.totalorder %s6147_s20, 3  ;;  %s6152_s11 = smov [#allocation2]  }
  0x28   : > { %s7819_s28 = scalar_select %p6288_p12, 1, 0 }
  0x29   : > { %s7820_s6 = scalar_select %p6292_p13, 1, 0 }
  0x2a   : > { %p6297_p2 = pnand %p5523_p10, %p175_p0  ;;  %s187_s14 = sshll.u32 %s6152_s11, 4  ;;  %s188_s14 = int_to_ptr.vmem [resolvable:$true] %s187_s14 }
  0x2b   : > { %s5992_s22 = scalar_lea.vmem %s240_s30, 1024  ;;  %s6153_s23 = smov [#allocation7]  }
  0x2c   : > { %p5874_p4 = pneg %p6297_p2  ;;  %p5993_p1 = scmp.ne.s32.totalorder %s240_s30, %s5992_s22 }
  0x2d   : > { %s5997_s24 = sshll.u32 %s6153_s23, 4  ;;  %s5998_s24 = int_to_ptr.vmem [resolvable:$false] %s5997_s24 }
  0x2e   : > { %p5995_p6 = pnand %p5993_p1, %p5953_p8  ;;  %s5999_s29 = scalar_lea.vmem %s5998_s24, 2048 }
  0x2f   : > { %p6000_p9 = scmp.lt.s32.totalorder %s240_s30, %s5998_s24  ;;  %p6001_p10 = scmp.lt.s32.totalorder %s5999_s29, %s5992_s22 }
  0x30   : > { %p5996_p3 = pneg %p5995_p6 }
  0x31   : > { %p6002_p0 = por %p6001_p10, %p6000_p9 }
  0x33   : > { %p6003_p5 = pnand %p6002_p0, %p5996_p3 }
  0x35   : > { %6006 = shalt.err (!%p6003_p5)
}
  0x36   : > { %5884 = dma.hbm_to_vmem [thread:$0]  (!%p6247_p7), %s6254_s12, 1024, %s240_s30, %s6256_s13, %s6150_s26, %s6150_s26, %s6151_s25  }
  0x37   : > { %p7822_p8 = scmp.eq.s32.totalorder %s6271_s5, 0  ;;  %s6018_s7 = scalar_lea.vmem %s188_s14, 256 }
  0x38   : > { %p6019_p9 = scmp.ne.s32.totalorder %s188_s14, %s6018_s7  ;;  %p6026_p10 = scmp.lt.s32.totalorder %s188_s14, %s188_s14 }
  0x39   : > { %p5875_p1 = pnand %p5874_p4, %p7822_p8  ;;  %p6027_p0 = scmp.lt.s32.totalorder %s6018_s7, %s6018_s7 }
  0x3b   : > { %p6009_p6 = pneg %p5875_p1  ;;  %p6028_p13 = por %p6027_p0, %p6026_p10 }
  0x3d   : > { %p6021_p3 = pnand %p6019_p9, %p6009_p6 }
  0x3f   : > { %p6022_p5 = pneg %p6021_p3 }
  0x41   : > { %p6029_p12 = pnand %p6028_p13, %p6022_p5 }
  0x43   : > { %6032 = shalt.err (!%p6029_p12)
}
  0x44   : > { %5877 = dma.hbm_to_vmem [thread:$0]  (!%p5875_p1), %s7805_s0, 256, %s188_s14, [#allocation3], %s6150_s26, %s6150_s26, %s6151_s25  }
  0x45   : > { %251 = sbr.rel (%p6297_p2) target bundleno = 612 (0x264), region = 32 }
  0x4a   : > { %p7823_p4 = scmp.eq.s32.totalorder %s6271_s5, 0 }
  0x4c   : > { %6110 = dma.done.wait (%p7823_p4), [#allocation3], 256   ;;  %p7824_p7 = pmov %p7823_p4 }
  0x4d   : > { %s257_s13 = sand.u32 1, %s6271_s5   ;;  %s6332_s30 = sand.u32 1, %s6131_s16  }
  0x4e   : > { %6112 = vsyncadd (%p7824_p7), [#allocation3], 4294967040  ;;  %s5534_s11 = sshll.u32 %s6332_s30, 6  ;;  %s258_s22 = scalar_lea.sflag [#allocation6], %s257_s13 }
  0x4f   : > { %s6337_s26 = scalar_lea.vmem [#allocation5], %s5534_s11 }
  0x50   : > { %6114 = dma.done.wait (%p6281_p11), %s258_s22, 2048  }
  0x51   : > { %6116 = vsyncadd (%p6281_p11), %s258_s22, 4294965248  ;;  %vm319_vm0 = vcmask 130048   ;;  %v310_v0 = vld [vmem:[#allocation2 + $0x8] sm:$0xff]  ;;  %v309_v1 = vld [vmem:[#allocation2] sm:$0xff]  ;;  %s6487_s25 = scalar_lea.vmem [#allocation7], %s5534_s11  ;;  %vm1137_vm1 = vcmask 1046528  }
  0x52   : > { %v311_v2 = vld [vmem:[%s6337_s26] sm:$0xff]  ;;  %v6344_v3 = vand.u32 4294901760, %v310_v0  ;;  %v6346_v4 = vand.u32 4294901760, %v309_v1  ;;  %v312_v6 = vld [vmem:[%s6337_s26 + $0x8] sm:$0xff]  ;;  %v313_v7 = vld [vmem:[%s6337_s26 + $0x10] sm:$0xff]  ;;  %vm1112_vm2 = vcmask 1040384  }
  0x53   : > { %v321_v5 = vsel %vm319_vm0, %v311_v2, 0  ;;  %v314_v8 = vld [vmem:[%s6337_s26 + $0x18] sm:$0xff]  ;;  %v324_v10 = vsel %vm319_vm0, %v312_v6, 0  ;;  %v327_v11 = vsel %vm319_vm0, %v313_v7, 0  ;;  %v315_v13 = vld [vmem:[%s6337_s26 + $0x20] sm:$0xff]  ;;  %v316_v14 = vld [vmem:[%s6337_s26 + $0x28] sm:$0xff] }
  0x54   : > { %v6352_v9 = vand.u32 4294901760, %v321_v5  ;;  %v330_v12 = vsel %vm319_vm0, %v314_v8, 0  ;;  %5670 = vmatprep.subr.mxu0 %v6344_v3  ;;  %v6361_v15 = vsub.f32 %v310_v0, %v6344_v3  ;;  %v6363_v16 = vand.u32 4294901760, %v324_v10  ;;  %v317_v39 = vld [vmem:[%s6337_s26 + $0x30] sm:$0xff]  ;;  %v318_v40 = vld [vmem:[%s6337_s26 + $0x38] sm:$0xff]  ;;  %v2819_v6 = vld [vmem:[%s6487_s25] sm:$0xff] }
  0x55   : > { %v6366_v17 = vsub.f32 %v309_v1, %v6346_v4  ;;  %v6368_v18 = vand.u32 4294901760, %v327_v11  ;;  %5671 = vmatpush3.msra.mxu0 %v6344_v3  ;;  %v6375_v20 = vand.u32 4294901760, %v330_v12  ;;  %v333_v21 = vsel %vm319_vm0, %v315_v13, 0  ;;  %v2820_v8 = vld [vmem:[%s6487_s25 + $0x8] sm:$0xff]  ;;  %s5536_s5 = sshll.u32 %s6332_s30, 7  ;;  %s5548_s8 = sshll.u32 %s6139_s18, 11 }
  0x56   : > { %v6372_v19 = vsub.f32 %v321_v5, %v6352_v9  ;;  %5690 = vmatprep.mubr.f32.mxu1 %v6352_v9  ;;  %v336_v22 = vsel %vm319_vm0, %v316_v14, 0  ;;  %5672 = vmatprep.subr.mxu0 %v6346_v4  ;;  %v6381_v23 = vand.u32 4294901760, %v6361_v15  ;;  %v6384_v24 = vsub.f32 %v324_v10, %v6363_v16  ;;  %v2821_v10 = vld [vmem:[%s6487_s25 + $0x10] sm:$0xff]  ;;  %v2822_v14 = vld [vmem:[%s6487_s25 + $0x18] sm:$0xff]  ;;  %s6772_s10 = scalar_lea.vmem [#allocation8], %s5536_s5  ;;  %s7307_s24 = scalar_lea.hbm %s7808_s3, %s5548_s8 }
  0x57   : > { %v6387_v25 = vand.u32 4294901760, %v6366_v17  ;;  %v6390_v26 = vsub.f32 %v327_v11, %v6368_v18  ;;  %5673 = vmatpush3.msra.mxu0 %v6346_v4  ;;  %v6395_v28 = vsub.f32 %v330_v12, %v6375_v20  ;;  %v6397_v29 = vand.u32 4294901760, %v333_v21  ;;  %s5345_s29 = sshll.u32 %s6772_s10, 4  ;;  %s5324_s7 = scalar_lea.sflag [#allocation4], %s6332_s30  ;;  %s7310_s29 = int_to_ptr.vmem [resolvable:$true] %s5345_s29 }
  0x58   : > { %v413_v27 = vand.u32 4294901760, %v6372_v19  ;;  %v6399_v30 = vand.u32 4294901760, %v336_v22  ;;  %v523_v31 = vsub.f32 %v6361_v15, %v6381_v23  ;;  %v423_v32 = vand.u32 4294901760, %v6384_v24  ;;  %5702 = vmatprep.subr.mxu0 %v6361_v15  ;;  %s6033_s9 = scalar_lea.vmem %s7310_s29, 2048  ;;  %p7871_p12 = scmp.ne.s32.totalorder %s7819_s28, 0 }
  0x59   : > { %v530_v33 = vsub.f32 %v6366_v17, %v6387_v25  ;;  %v433_v34 = vand.u32 4294901760, %v6390_v26  ;;  %v443_v36 = vand.u32 4294901760, %v6395_v28  ;;  %v6413_v37 = vsub.f32 %v333_v21, %v6397_v29  ;;  %p6034_p11 = scmp.ne.s32.totalorder %s7310_s29, %s6033_s9  ;;  %s6156_s12 = smov [#allocation8]  }
  0x5a   : > { %v414_v35 = vsub.f32 %v6372_v19, %v413_v27  ;;  %v6416_v38 = vsub.f32 %v336_v22, %v6399_v30  ;;  %v6420_v41 = vand.u32 4294901760, %v523_v31  ;;  %v424_v42 = vsub.f32 %v6384_v24, %v423_v32  ;;  %v2825_v31 = vld [vmem:[%s6487_s25 + $0x30] sm:$0xff]  ;;  %s6037_s13 = sshll.u32 %s6156_s12, 4  ;;  %s6038_s13 = int_to_ptr.vmem [resolvable:$false] %s6037_s13 }
  0x5b   : > { %v6425_v43 = vand.u32 4294901760, %v530_v33  ;;  %v434_v44 = vsub.f32 %v6390_v26, %v433_v34  ;;  %v444_v46 = vsub.f32 %v6395_v28, %v443_v36  ;;  %v453_v47 = vand.u32 4294901760, %v6413_v37  ;;  %p6035_p13 = pnand %p6034_p11, %p7871_p12  ;;  %s6039_s11 = scalar_lea.vmem %s6038_s13, 4096 }
  0x5c   : > { %v415_v45 = vand.u32 4294901760, %v414_v35  ;;  %v463_v48 = vand.u32 4294901760, %v6416_v38  ;;  %5686 = vmatprep.subr.mxu1 %v6420_v41  ;;  %v425_v49 = vand.u32 4294901760, %v424_v42  ;;  %v339_v50 = vsel %vm319_vm0, %v317_v39, 0  ;;  %p6040_p8 = scmp.lt.s32.totalorder %s7310_s29, %s6038_s13  ;;  %p6041_p1 = scmp.lt.s32.totalorder %s6039_s11, %s6033_s9 }
  0x5d   : > { %v342_v51 = vsel %vm319_vm0, %v318_v40, 0  ;;  %5687 = vmatpush3.msra.mxu1 %v6420_v41  ;;  %v435_v52 = vand.u32 4294901760, %v434_v44  ;;  %v454_v53 = vsub.f32 %v6413_v37, %v453_v47  ;;  %v6442_v54 = vand.u32 4294901760, %v339_v50  ;;  %p6036_p2 = pneg %p6035_p13 }
  0x5e   : > { %5674 = vmatprep.mubr.f32.mxu0 %v415_v45  ;;  %5688 = vmatprep.subr.mxu1 %v6425_v43  ;;  %v445_v55 = vand.u32 4294901760, %v444_v46  ;;  %v464_v56 = vsub.f32 %v6416_v38, %v463_v48  ;;  %v6448_v57 = vand.u32 4294901760, %v342_v51  ;;  %v2828_v7 = vsel %vm319_vm0, %v2819_v6, 0  ;;  %p6042_p6 = por %p6041_p1, %p6040_p8 }
  0x5f   : > { %5675 = vmatmul.mubr.f32.vlgmr.msra.gmra.mxu0 %v425_v49  ;;  %5689 = vmatpush3.msra.mxu1 %v6425_v43  ;;  %v455_v58 = vand.u32 4294901760, %v454_v53  ;;  %v472_v59 = vsub.f32 %v339_v50, %v6442_v54  ;;  %v6505_v11 = vand.u32 4294901760, %v2828_v7  ;;  %v2831_v12 = vsel %vm319_vm0, %v2820_v8, 0 }
  0x60   : > { %5703 = vmatpush3.msra.mxu0 %v6361_v15  ;;  %5691 = vmatmul.mubr.f32.vlgmr.msra.gmra.mxu1 %v6363_v16  ;;  %v6456_v60 = vsub.f32 %v342_v51, %v6448_v57  ;;  %v465_v62 = vand.u32 4294901760, %v464_v56  ;;  %v2834_v13 = vsel %vm319_vm0, %v2821_v10, 0  ;;  %v6514_v21 = vand.u32 4294901760, %v2831_v12  ;;  %p6043_p9 = pnand %p6042_p6, %p6036_p2 }
  0x61   : > { %5718 = vmatprep.subr.mxu1 %v6344_v3  ;;  %5677 = vmatprep.mubr.f32.mxu0 %v435_v52  ;;  %v473_v61 = vand.u32 4294901760, %v472_v59  ;;  %v6516_v22 = vand.u32 4294901760, %v2834_v13  ;;  %vm2802_vm3 = vcmask 261120  }
  0x62   : > { %5719 = vmatpush3.msra.mxu1 %v6344_v3  ;;  %5693 = vmatprep.mubr.f32.mxu1 %v6368_v18  ;;  %v483_v63 = vand.u32 4294901760, %v6456_v60 }
  0x63   : > { %5678 = vmatmul.mubr.f32.gmra.mxu0 %v445_v55  ;;  %5704 = vmatprep.subr.mxu0 %v6366_v17  ;;  %v474_v0 = vsub.f32 %v472_v59, %v473_v61  ;;  %v6532_v33 = vsub.f32 %v2834_v13, %v6516_v22 }
  0x64   : > { %5680 = vmatprep.mubr.f32.mxu0 %v455_v58  ;;  %5694 = vmatmul.mubr.f32.gmra.mxu1 %v6375_v20  ;;  %v484_v1 = vsub.f32 %v6456_v60, %v483_v63 }
  0x65   : > { %5705 = vmatpush3.msra.mxu0 %v6366_v17  ;;  %5696 = vmatprep.mubr.f32.mxu1 %v6397_v29  ;;  %v475_v2 = vand.u32 4294901760, %v474_v0  ;;  %v2940_v40 = vand.u32 4294901760, %v6532_v33 }
  0x66   : > { %5720 = vmatprep.subr.mxu1 %v6346_v4  ;;  %v485_v5 = vand.u32 4294901760, %v484_v1  ;;  %5734 = vmatprep.subr.mxu0 %v6381_v23 }
  0x67   : > { %5681 = vmatmul.mubr.f32.gmra.mxu0 %v465_v62  ;;  %5721 = vmatpush3.msra.mxu1 %v6346_v4 }
  0x68   : > { %5683 = vmatprep.mubr.f32.mxu0 %v475_v2  ;;  %5697 = vmatmul.mubr.f32.gmra.mxu1 %v6399_v30 }
  0x69   : > { %5750 = vmatprep.subr.mxu1 %v6344_v3  ;;  %5699 = vmatprep.mubr.f32.mxu1 %v6442_v54 }
  0x6b   : > { %5684 = vmatmul.mubr.f32.gmra.mxu0 %v485_v5 }
  0x6c   : > { %5706 = vmatprep.mubr.f32.mxu0 %v6372_v19  ;;  %5700 = vmatmul.mubr.f32.gmra.mxu1 %v6448_v57  ;;  %v2823_v19 = vld [vmem:[%s6487_s25 + $0x20] sm:$0xff] }
  0x6d   : > { %5722 = vmatprep.mubr.f32.mxu1 %v413_v27  ;;  %v2840_v27 = vsel %vm319_vm0, %v2823_v19, 0 }
  0x6f   : > { %5707 = vmatmul.mubr.f32.vlgmr.msra.gmra.mxu0 %v6384_v24  ;;  %v6520_v24 = vsub.f32 %v2828_v7, %v6505_v11 }
  0x70   : > { %5735 = vmatpush3.msra.mxu0 %v6381_v23  ;;  %5709 = vmatprep.mubr.f32.mxu0 %v6390_v26  ;;  %v2837_v26 = vsel %vm319_vm0, %v2822_v14, 0 }
  0x71   : > { %5723 = vmatmul.mubr.f32.vlgmr.msra.gmra.mxu1 %v423_v32  ;;  %5736 = vmatprep.subr.mxu0 %v6387_v25  ;;  %v6529_v32 = vsub.f32 %v2831_v12, %v6514_v21  ;;  %v2920_v35 = vand.u32 4294901760, %v6520_v24 }
  0x72   : > { %5751 = vmatpush3.msra.mxu1 %v6344_v3  ;;  %5725 = vmatprep.mubr.f32.mxu1 %v433_v34  ;;  %v6534_v34 = vand.u32 4294901760, %v2837_v26 }
  0x73   : > { %5710 = vmatmul.mubr.f32.gmra.mxu0 %v6395_v28  ;;  %5752 = vmatprep.subr.mxu1 %v6346_v4  ;;  %v2824_v28 = vld [vmem:[%s6487_s25 + $0x28] sm:$0xff]  ;;  %v2930_v39 = vand.u32 4294901760, %v6529_v32 }
  0x74   : > { %5712 = vmatprep.mubr.f32.mxu0 %v6413_v37  ;;  %5737 = vmatpush3.msra.mxu0 %v6387_v25  ;;  %v2846_v37 = vsel %vm319_vm0, %v2825_v31, 0  ;;  %v6553_v42 = vsub.f32 %v2837_v26, %v6534_v34 }
  0x75   : > { %5726 = vmatmul.mubr.f32.gmra.mxu1 %v443_v36  ;;  %5766 = vmatprep.subr.mxu0 %v6344_v3  ;;  %v6539_v36 = vand.u32 4294901760, %v2840_v27  ;;  %v6565_v44 = vand.u32 4294901760, %v2846_v37  ;;  %v2931_v46 = vsub.f32 %v6529_v32, %v2930_v39 }
  0x76   : > { %5728 = vmatprep.mubr.f32.mxu1 %v453_v47  ;;  %5753 = vmatpush3.msra.mxu1 %v6346_v4  ;;  %v2950_v47 = vand.u32 4294901760, %v6553_v42 }
  0x77   : > { %5713 = vmatmul.mubr.f32.gmra.mxu0 %v6416_v38  ;;  %5782 = vmatprep.subr.mxu1 %v6420_v41  ;;  %v2826_v38 = vld [vmem:[%s6487_s25 + $0x38] sm:$0xff]  ;;  %v6589_v50 = vsub.f32 %v2846_v37, %v6565_v44  ;;  %v2932_v51 = vand.u32 4294901760, %v2931_v46 }
  0x78   : > { %5715 = vmatprep.mubr.f32.mxu0 %v472_v59  ;;  %v2849_v45 = vsel %vm319_vm0, %v2826_v38, 0  ;;  %v2951_v52 = vsub.f32 %v6553_v42, %v2950_v47 }
  0x79   : > { %5729 = vmatmul.mubr.f32.gmra.mxu1 %v463_v48  ;;  %v2980_v59 = vand.u32 4294901760, %v6589_v50 }
  0x7a   : > { %5731 = vmatprep.mubr.f32.mxu1 %v473_v61 }
  0x7b   : > { %5716 = vmatmul.mubr.f32.gmra.mxu0 %v6456_v60  ;;  %v2981_v62 = vsub.f32 %v6589_v50, %v2980_v59 }
  0x7c   : > { %5738 = vmatprep.mubr.f32.mxu0 %v6352_v9 }
  0x7d   : > { %5732 = vmatmul.mubr.f32.gmra.mxu1 %v483_v63 }
  0x7e   : > { %5754 = vmatprep.mubr.f32.mxu1 %v6352_v9  ;;  %v2843_v9 = vsel %vm319_vm0, %v2824_v28, 0 }
  0x7f   : > { %5739 = vmatmul.mubr.f32.vlgmr.msra.gmra.mxu0 %v6363_v16 }
  0x80   : > { %5767 = vmatpush3.msra.mxu0 %v6344_v3  ;;  %5741 = vmatprep.mubr.f32.mxu0 %v6368_v18 }
  0x81   : > { %5755 = vmatmul.mubr.f32.vlgmr.msra.gmra.mxu1 %v6363_v16  ;;  %5768 = vmatprep.subr.mxu0 %v6346_v4  ;;  %v6555_v16 = vand.u32 4294901760, %v2843_v9 }
  0x82   : > { %5783 = vmatpush3.msra.mxu1 %v6420_v41  ;;  %5757 = vmatprep.mubr.f32.mxu1 %v6368_v18  ;;  %v2921_v18 = vsub.f32 %v6520_v24, %v2920_v35  ;;  %v6563_v41 = vsub.f32 %v2840_v27, %v6539_v36 }
  0x83   : > { %5742 = vmatmul.mubr.f32.gmra.mxu0 %v6375_v20  ;;  %5784 = vmatprep.subr.mxu1 %v6425_v43  ;;  %v6579_v48 = vsub.f32 %v2843_v9, %v6555_v16 }
  0x84   : > { %5744 = vmatprep.mubr.f32.mxu0 %v6397_v29  ;;  %5769 = vmatpush3.msra.mxu0 %v6346_v4  ;;  %v2960_v49 = vand.u32 4294901760, %v6563_v41 }
  0x85   : > { %5758 = vmatmul.mubr.f32.gmra.mxu1 %v6375_v20  ;;  %5798 = vmatprep.subr.mxu0 %v6361_v15  ;;  %v6581_v20 = vand.u32 4294901760, %v2849_v45  ;;  %v2970_v53 = vand.u32 4294901760, %v6579_v48 }
  0x86   : > { %5760 = vmatprep.mubr.f32.mxu1 %v6397_v29  ;;  %5785 = vmatpush3.msra.mxu1 %v6425_v43  ;;  %v2922_v29 = vand.u32 4294901760, %v2921_v18  ;;  %v2941_v43 = vsub.f32 %v6532_v33, %v2940_v40  ;;  %v2961_v58 = vsub.f32 %v6563_v41, %v2960_v49 }
  0x87   : > { %5745 = vmatmul.mubr.f32.gmra.mxu0 %v6399_v30  ;;  %5814 = vmatprep.subr.mxu1 %v6344_v3  ;;  %v2989_v55 = vsub.f32 %v2849_v45, %v6581_v20  ;;  %v6154_v45 = vmov 1966171168  }
  0x88   : > { %5747 = vmatprep.mubr.f32.mxu0 %v6442_v54  ;;  %v2942_v56 = vand.u32 4294901760, %v2941_v43  ;;  %v2962_v61 = vand.u32 4294901760, %v2961_v58  ;;  %v1212_v46 = vunpack.c.l.s4 %v6154_v45 }
  0x89   : > { %5761 = vmatmul.mubr.f32.gmra.mxu1 %v6399_v30  ;;  %v2952_v30 = vand.u32 4294901760, %v2951_v52  ;;  %v2990_v60 = vand.u32 4294901760, %v2989_v55  ;;  %v6155_v52 = vmov 1983009808  }
  0x8a   : > { %5763 = vmatprep.mubr.f32.mxu1 %v6442_v54  ;;  %v2971_v54 = vsub.f32 %v6579_v48, %v2970_v53 }
  0x8b   : > { %5748 = vmatmul.mubr.f32.gmra.mxu0 %v6448_v57  ;;  %v2991_v63 = vsub.f32 %v2989_v55, %v2990_v60 }
  0x8c   : > { %5770 = vmatprep.mubr.f32.mxu0 %v2922_v29 }
  0x8d   : > { %5764 = vmatmul.mubr.f32.gmra.mxu1 %v6448_v57  ;;  %v2972_v57 = vand.u32 4294901760, %v2971_v54  ;;  %v2992_v0 = vand.u32 4294901760, %v2991_v63 }
  0x8e   : > { %5786 = vmatprep.mubr.f32.mxu1 %v6505_v11 }
  0x8f   : > { %5771 = vmatmul.mubr.f32.vlgmr.msra.gmra.mxu0 %v2932_v51 }
  0x90   : > { %5799 = vmatpush3.msra.mxu0 %v6361_v15  ;;  %5773 = vmatprep.mubr.f32.mxu0 %v2942_v56  ;;  %v2982_v15 = vand.u32 4294901760, %v2981_v62 }
  0x91   : > { %5787 = vmatmul.mubr.f32.vlgmr.msra.gmra.mxu1 %v6514_v21  ;;  %5800 = vmatprep.subr.mxu0 %v6366_v17 }
  0x92   : > { %5815 = vmatpush3.msra.mxu1 %v6344_v3  ;;  %5789 = vmatprep.mubr.f32.mxu1 %v6516_v22 }
  0x93   : > { %5774 = vmatmul.mubr.f32.gmra.mxu0 %v2952_v30  ;;  %5816 = vmatprep.subr.mxu1 %v6346_v4 }
  0x94   : > { %5776 = vmatprep.mubr.f32.mxu0 %v2962_v61  ;;  %5801 = vmatpush3.msra.mxu0 %v6366_v17 }
  0x95   : > { %5790 = vmatmul.mubr.f32.gmra.mxu1 %v6534_v34  ;;  %5830 = vmatprep.subr.mxu0 %v6381_v23 }
  0x96   : > { %5792 = vmatprep.mubr.f32.mxu1 %v6539_v36  ;;  %5817 = vmatpush3.msra.mxu1 %v6346_v4 }
  0x97   : > { %5777 = vmatmul.mubr.f32.gmra.mxu0 %v2972_v57  ;;  %5846 = vmatprep.subr.mxu1 %v6344_v3 }
  0x98   : > { %5779 = vmatprep.mubr.f32.mxu0 %v2982_v15 }
  0x99   : > { %5793 = vmatmul.mubr.f32.gmra.mxu1 %v6555_v16 }
  0x9a   : > { %5795 = vmatprep.mubr.f32.mxu1 %v6565_v44 }
  0x9b   : > { %5780 = vmatmul.mubr.f32.gmra.mxu0 %v2992_v0 }
  0x9c   : > { %5802 = vmatprep.mubr.f32.mxu0 %v6520_v24 }
  0x9d   : > { %5796 = vmatmul.mubr.f32.gmra.mxu1 %v6581_v20 }
  0x9e   : > { %5818 = vmatprep.mubr.f32.mxu1 %v2920_v35 }
  0x9f   : > { %5803 = vmatmul.mubr.f32.vlgmr.msra.gmra.mxu0 %v6529_v32 }
  0xa0   : > { %5831 = vmatpush3.msra.mxu0 %v6381_v23  ;;  %5805 = vmatprep.mubr.f32.mxu0 %v6532_v33 }
  0xa1   : > { %5819 = vmatmul.mubr.f32.vlgmr.msra.gmra.mxu1 %v2930_v39  ;;  %5832 = vmatprep.subr.mxu0 %v6387_v25 }
  0xa2   : > { %5847 = vmatpush3.msra.mxu1 %v6344_v3  ;;  %5821 = vmatprep.mubr.f32.mxu1 %v2940_v40 }
  0xa3   : > { %5806 = vmatmul.mubr.f32.gmra.mxu0 %v6553_v42  ;;  %5848 = vmatprep.subr.mxu1 %v6346_v4 }
  0xa4   : > { %5808 = vmatprep.mubr.f32.mxu0 %v6563_v41  ;;  %5833 = vmatpush3.msra.mxu0 %v6387_v25 }
  0xa5   : > { %5822 = vmatmul.mubr.f32.gmra.mxu1 %v2950_v47  ;;  %v1214_v47 = vlaneseq }
  0xa6   : > { %5824 = vmatprep.mubr.f32.mxu1 %v2960_v49  ;;  %5849 = vmatpush3.msra.mxu1 %v6346_v4 }
  0xa7   : > { %5809 = vmatmul.mubr.f32.gmra.mxu0 %v6579_v48  ;;  %v1215_v61 = vshrl.u32 %v1214_v47, 7 }
  0xa8   : > { %5811 = vmatprep.mubr.f32.mxu0 %v6589_v50 }
  0xa9   : > { %5825 = vmatmul.mubr.f32.gmra.mxu1 %v2970_v53  ;;  %v2517_v53 = vunpack.c.l.s4 %v6155_v52 }
  0xaa   : > { %5827 = vmatprep.mubr.f32.mxu1 %v2980_v59 }
  0xab   : > { %5812 = vmatmul.mubr.f32.gmra.mxu0 %v2989_v55 }
  0xac   : > { %5834 = vmatprep.mubr.f32.mxu0 %v6505_v11 }
  0xad   : > { %5828 = vmatmul.mubr.f32.gmra.mxu1 %v2990_v60  ;;  %v1213_v60 = vunpack.c.0.s8 %v1212_v46 }
  0xae   : > { %5850 = vmatprep.mubr.f32.mxu1 %v6505_v11 }
  0xaf   : > { %5835 = vmatmul.mubr.f32.vlgmr.msra.gmra.mxu0 %v6514_v21 }
  0xb0   : > { %5837 = vmatprep.mubr.f32.mxu0 %v6516_v22 }
  0xb1   : > { %5851 = vmatmul.mubr.f32.vlgmr.msra.gmra.mxu1 %v6514_v21 }
  0xb2   : > { %5853 = vmatprep.mubr.f32.mxu1 %v6516_v22 }
  0xb3   : > { %5838 = vmatmul.mubr.f32.gmra.mxu0 %v6534_v34 }
  0xb4   : > { %5840 = vmatprep.mubr.f32.mxu0 %v6539_v36 }
  0xb5   : > { %5854 = vmatmul.mubr.f32.gmra.mxu1 %v6534_v34 }
  0xb6   : > { %5856 = vmatprep.mubr.f32.mxu1 %v6539_v36 }
  0xb7   : > { %5841 = vmatmul.mubr.f32.gmra.mxu0 %v6555_v16 }
  0xb8   : > { %5843 = vmatprep.mubr.f32.mxu0 %v6565_v44 }
  0xb9   : > { %5857 = vmatmul.mubr.f32.gmra.mxu1 %v6555_v16 }
  0xba   : > { %5859 = vmatprep.mubr.f32.mxu1 %v6565_v44 }
  0xbb   : > { %5844 = vmatmul.mubr.f32.gmra.mxu0 %v6581_v20 }
  0xbd   : > { %5860 = vmatmul.mubr.f32.gmra.mxu1 %v6581_v20 }
 0x11f   : > { %v5676_v3 = vpop.f32.mrf.mxu0 }
 0x120   : > { %v5692_v17 = vpop.f32.mrf.mxu1 }
 0x121   : > { %v417_v4 = vpop.f32.mrf.mxu0  ;;  %v575_v9 = vadd.f32 %v5692_v17, %v5676_v3 }
 0x122   : > { %v568_v25 = vpop.f32.mrf.mxu1 }
 0x123   : > { %v5679_v23 = vpop.f32.mrf.mxu0  ;;  %v569_v40 = vadd.f32 %v568_v25, %v417_v4  ;;  %v2518_v4 = vunpack.c.0.s8 %v2517_v53 }
 0x124   : > { %v5695_v2 = vpop.f32.mrf.mxu1 }
 0x125   : > { %v437_v1 = vpop.f32.mrf.mxu0  ;;  %v587_v48 = vadd.f32 %v5695_v2, %v5679_v23 }
 0x126   : > { %v580_v6 = vpop.f32.mrf.mxu1 }
 0x127   : > { %v5682_v5 = vpop.f32.mrf.mxu0  ;;  %v581_v49 = vadd.f32 %v580_v6, %v437_v1 }
 0x128   : > { %v5698_v8 = vpop.f32.mrf.mxu1 }
 0x129   : > { %v457_v7 = vpop.f32.mrf.mxu0  ;;  %v599_v10 = vadd.f32 %v5698_v8, %v5682_v5 }
 0x12a   : > { %v592_v12 = vpop.f32.mrf.mxu1 }
 0x12b   : > { %v5685_v11 = vpop.f32.mrf.mxu0  ;;  %v593_v13 = vadd.f32 %v592_v12, %v457_v7  ;;  %v6663_v7 = vsub.s32 %v1213_v60, %v1215_v61 }
 0x12c   : > { %v5701_v19 = vpop.f32.mrf.mxu1 }
 0x12d   : > { %v477_v14 = vpop.f32.mrf.mxu0  ;;  %v611_v21 = vadd.f32 %v5701_v19, %v5685_v11  ;;  %7825 = vst [vmem:[#allocation15_spill] sm:$0xff] %v6663_v7  ;;  %v6665_v11 = vsub.s32 0, %v1215_v61 }
 0x12e   : > { %v604_v22 = vpop.f32.mrf.mxu1 }
 0x12f   : > { %v5708_v24 = vpop.f32.mrf.mxu0  ;;  %v605_v26 = vadd.f32 %v604_v22, %v477_v14 }
 0x130   : > { %v694_v42 = vadd.f32 %v5708_v24, %v575_v9 }
 0x131   : > { %v686_v27 = vpop.f32.mrf.mxu0  ;;  %v5724_v28 = vpop.f32.mrf.mxu1 }
 0x132   : > { %v687_v20 = vadd.f32 %v686_v27, %v569_v40  ;;  %v819_v55 = vadd.f32 %v5724_v28, %v694_v42 }
 0x133   : > { %v5711_v31 = vpop.f32.mrf.mxu0  ;;  %v810_v32 = vpop.f32.mrf.mxu1 }
 0x134   : > { %v708_v56 = vadd.f32 %v5711_v31, %v587_v48  ;;  %v811_v62 = vadd.f32 %v810_v32, %v687_v20 }
 0x135   : > { %v700_v33 = vpop.f32.mrf.mxu0  ;;  %v5727_v34 = vpop.f32.mrf.mxu1 }
 0x136   : > { %v701_v57 = vadd.f32 %v700_v33, %v581_v49  ;;  %v835_v17 = vadd.f32 %v5727_v34, %v708_v56 }
 0x137   : > { %v5714_v35 = vpop.f32.mrf.mxu0  ;;  %v826_v36 = vpop.f32.mrf.mxu1 }
 0x138   : > { %v722_v37 = vadd.f32 %v5714_v35, %v599_v10  ;;  %v827_v5 = vadd.f32 %v826_v36, %v701_v57 }
 0x139   : > { %v714_v38 = vpop.f32.mrf.mxu0  ;;  %v5730_v39 = vpop.f32.mrf.mxu1 }
 0x13a   : > { %v715_v16 = vadd.f32 %v714_v38, %v593_v13  ;;  %v851_v18 = vadd.f32 %v5730_v39, %v722_v37  ;;  %v6667_v13 = vsub.s32 %v2518_v4, %v1215_v61 }
 0x13b   : > { %v5717_v41 = vpop.f32.mrf.mxu0  ;;  %v842_v44 = vpop.f32.mrf.mxu1 }
 0x13c   : > { %v736_v29 = vadd.f32 %v5717_v41, %v611_v21  ;;  %v6657_v43 = vadd.f32 %v842_v44, %v715_v16 }
 0x13d   : > { %v728_v50 = vpop.f32.mrf.mxu0  ;;  %v5733_v51 = vpop.f32.mrf.mxu1 }
 0x13e   : > { %v729_v58 = vadd.f32 %v728_v50, %v605_v26  ;;  %v6659_v59 = vadd.f32 %v5733_v51, %v736_v29 }
 0x13f   : > { %v858_v30 = vpop.f32.mrf.mxu1  ;;  %v5740_v54 = vpop.f32.mrf.mxu0 }
 0x140   : > { %v6661_v63 = vadd.f32 %v858_v30, %v729_v58  ;;  %v950_v15 = vadd.f32 %v5740_v54, %v819_v55 }
 0x141   : > { %v943_v0 = vpop.f32.mrf.mxu0  ;;  %v5756_v3 = vpop.f32.mrf.mxu1 }
 0x142   : > { %v944_v23 = vadd.f32 %v943_v0, %v811_v62  ;;  %v1065_v25 = vadd.f32 %v5756_v3, %v950_v15 }
 0x143   : > { %v5743_v1 = vpop.f32.mrf.mxu0  ;;  %v1058_v2 = vpop.f32.mrf.mxu1 }
 0x144   : > { %v1139_v6 = vrot.slane %v1065_v25, 1  ;;  %v962_v8 = vadd.f32 %v5743_v1, %v835_v17  ;;  %v1114_v10 = vrot.slane %v1065_v25, 7  ;;  %v1059_v12 = vadd.f32 %v1058_v2, %v944_v23 }
 0x145   : > { %v955_v14 = vpop.f32.mrf.mxu0  ;;  %v5759_v19 = vpop.f32.mrf.mxu1  ;;  %v1163_v22 = vmul.f32 0.75, %v1065_v25 }
 0x146   : > { %v1158_v21 = vsel %vm1137_vm1, %v1139_v6, %v1065_v25  ;;  %v956_v24 = vadd.f32 %v955_v14, %v827_v5  ;;  %v6670_v26 = vadd.f32 %v5759_v19, %v962_v8  ;;  %v1113_v28 = vrot.slane %v1059_v12, 7 }
 0x147   : > { %v1187_v27 = vmul.f32 0.25, %v1158_v21  ;;  %v1138_v31 = vrot.slane %v1059_v12, 1  ;;  %v1162_v32 = vmul.f32 0.75, %v1059_v12  ;;  %v5746_v33 = vpop.f32.mrf.mxu0  ;;  %v1070_v37 = vpop.f32.mrf.mxu1 }
 0x148   : > { %v1117_v34 = vrot.slane %v6670_v26, 7  ;;  %v1142_v35 = vrot.slane %v6670_v26, 1  ;;  %v6675_v36 = vmul.f32 0.75, %v6670_v26  ;;  %v6677_v9 = vadd.f32 %v5746_v33, %v851_v18 }
 0x149   : > { %v1195_v38 = vadd.f32 %v1187_v27, %v1163_v22  ;;  %v1115_v39 = vsel %vm1112_vm2, %v1113_v28, %v1114_v10  ;;  %v1133_v40 = vsel %vm1112_vm2, %v1059_v12, %v1113_v28  ;;  %v1140_v42 = vsel %vm1137_vm1, %v1138_v31, %v1139_v6  ;;  %v967_v16 = vpop.f32.mrf.mxu0 }
 0x14a   : > { %v1170_v41 = vmul.f32 0.25, %v1133_v40  ;;  %v1171_v44 = vmul.f32 0.25, %v1115_v39  ;;  %v1186_v45 = vmul.f32 0.25, %v1140_v42  ;;  %v1159_v46 = vsel %vm1137_vm1, %v1142_v35, %v6670_v26 }
 0x14b   : > { %v1723_v47 = vcombine.high %v1195_v38, %v1195_v38  ;;  %v1730_v18 = vrot.slane %v1195_v38, %v6663_v7  ;;  %v1189_v48 = vmul.f32 0.25, %v1159_v46  ;;  %v6687_v20 = vadd.f32 %v1070_v37, %v956_v24 }
 0x14c   : > { %v1178_v29 = vadd.f32 %v1170_v41, %v1162_v32  ;;  %v1179_v49 = vadd.f32 %v1171_v44, %v1163_v22  ;;  %v1194_v50 = vadd.f32 %v1186_v45, %v1162_v32  ;;  %v6690_v51 = vadd.f32 %v967_v16, %v6657_v43 }
 0x14d   : > { %v1737_v52 = vrot.slane %v1723_v47, %v6663_v7  ;;  %v1738_v53 = vcombine.high %v1730_v18, %v1730_v18  ;;  %v1746_v55 = vrot.slane %v1730_v18, %v6663_v7  ;;  %v6695_v56 = vadd.f32 %v1189_v48, %v6675_v36 }
 0x14e   : > { %v1210_v58 = vcombine.high %v1178_v29, %v1178_v29  ;;  %v1217_v30 = vrot.slane %v1178_v29, %v6663_v7  ;;  %v1259_v54 = vcombine.high %v1179_v49, %v1179_v49  ;;  %v1266_v60 = vrot.slane %v1179_v49, %v6663_v7 }
 0x14f   : > { %v1739_v61 = vcombine.high %v1737_v52, %v1737_v52  ;;  %v1753_v62 = vrot.slane %v1737_v52, %v6663_v7  ;;  %v1760_v43 = vrot.slane %v1738_v53, %v6663_v7  ;;  %v1768_v57 = vcombine.high %v1746_v55, %v1746_v55 }
 0x150   : > { %v2101_v15 = vrot.slane %v1746_v55, %v6665_v11  ;;  %v1224_v0 = vrot.slane %v1210_v58, %v6663_v7  ;;  %v1225_v3 = vcombine.high %v1217_v30, %v1217_v30  ;;  %v1233_v4 = vrot.slane %v1217_v30, %v6663_v7 }
 0x151   : > { %v1767_v17 = vrot.slane %v1739_v61, %v6663_v7  ;;  %v1769_v23 = vcombine.high %v1753_v62, %v1753_v62  ;;  %v1770_v25 = vcombine.high %v1760_v43, %v1760_v43  ;;  %v2105_v1 = vrot.slane %v1760_v43, %v6665_v11 }
 0x152   : > { %v2109_v2 = vrot.slane %v1768_v57, %v6665_v11  ;;  %v2117_v5 = vrot.slane %v1753_v62, %v6665_v11  ;;  %v1226_v6 = vcombine.high %v1224_v0, %v1224_v0  ;;  %v1240_v8 = vrot.slane %v1224_v0, %v6663_v7 }
 0x153   : > { %v1771_v10 = vcombine.high %v1767_v17, %v1767_v17  ;;  %v2113_v12 = vrot.slane %v1770_v25, %v6665_v11  ;;  %v2121_v14 = vrot.slane %v1767_v17, %v6665_v11  ;;  %v2125_v19 = vrot.slane %v1769_v23, %v6665_v11 }
 0x154   : > { %v1247_v21 = vrot.slane %v1225_v3, %v6663_v7  ;;  %v1254_v22 = vrot.slane %v1226_v6, %v6663_v7  ;;  %v1255_v24 = vcombine.high %v1233_v4, %v1233_v4  ;;  %v1256_v27 = vcombine.high %v1240_v8, %v1240_v8 }
 0x155   : > { %v2129_v28 = vrot.slane %v1771_v10, %v6665_v11  ;;  %v1273_v31 = vrot.slane %v1259_v54, %v6663_v7  ;;  %v1274_v32 = vcombine.high %v1266_v60, %v1266_v60  ;;  %v1282_v33 = vrot.slane %v1266_v60, %v6663_v7 }
 0x156   : > { %v1257_v37 = vcombine.high %v1247_v21, %v1247_v21  ;;  %v1258_v38 = vcombine.high %v1254_v22, %v1254_v22  ;;  %v1674_v39 = vcombine.high %v1194_v50, %v1194_v50  ;;  %v1681_v40 = vrot.slane %v1194_v50, %v6663_v7 }
 0x157   : > { %v1275_v42 = vcombine.high %v1273_v31, %v1273_v31  ;;  %v1289_v16 = vrot.slane %v1273_v31, %v6663_v7  ;;  %v1296_v41 = vrot.slane %v1274_v32, %v6663_v7  ;;  %v1304_v44 = vcombine.high %v1282_v33, %v1282_v33 }
 0x158   : > { %v1688_v45 = vrot.slane %v1674_v39, %v6663_v7  ;;  %v1689_v46 = vcombine.high %v1681_v40, %v1681_v40  ;;  %v1697_v47 = vrot.slane %v1681_v40, %v6663_v7  ;;  %v2394_v18 = vsel %vm1112_vm2, %v1282_v33, %v2101_v15  ;;  %v6747_v40 = vpop.f32.mrf.mxu1 }
 0x159   : > { %v1303_v48 = vrot.slane %v1275_v42, %v6663_v7  ;;  %v1305_v29 = vcombine.high %v1289_v16, %v1289_v16  ;;  %v1306_v49 = vcombine.high %v1296_v41, %v1296_v41  ;;  %v2395_v52 = vsel %vm1112_vm2, %v1296_v41, %v2105_v1 }
 0x15a   : > { %v1690_v50 = vcombine.high %v1688_v45, %v1688_v45  ;;  %v1704_v53 = vrot.slane %v1688_v45, %v6663_v7  ;;  %v1711_v55 = vrot.slane %v1689_v46, %v6663_v7  ;;  %v1719_v58 = vcombine.high %v1697_v47, %v1697_v47  ;;  %v6755_v46 = vpop.f32.mrf.mxu0 }
 0x15b   : > { %v1307_v30 = vcombine.high %v1303_v48, %v1303_v48  ;;  %v2069_v54 = vrot.slane %v1697_v47, %v6665_v11  ;;  %v2396_v60 = vsel %vm1112_vm2, %v1304_v44, %v2109_v2  ;;  %v2397_v61 = vsel %vm1112_vm2, %v1306_v49, %v2113_v12 }
 0x15c   : > { %v1718_v62 = vrot.slane %v1690_v50, %v6663_v7  ;;  %v1720_v43 = vcombine.high %v1704_v53, %v1704_v53  ;;  %v1721_v57 = vcombine.high %v1711_v55, %v1711_v55  ;;  %v2073_v15 = vrot.slane %v1711_v55, %v6665_v11 }
 0x15d   : > { %v2077_v0 = vrot.slane %v1719_v58, %v6665_v11  ;;  %v2085_v3 = vrot.slane %v1704_v53, %v6665_v11  ;;  %v2386_v17 = vsel %vm1112_vm2, %v1233_v4, %v2069_v54  ;;  %v2398_v23 = vsel %vm1112_vm2, %v1289_v16, %v2117_v5 }
 0x15e   : > { %v1722_v25 = vcombine.high %v1718_v62, %v1718_v62  ;;  %v2081_v1 = vrot.slane %v1721_v57, %v6665_v11  ;;  %v2089_v2 = vrot.slane %v1718_v62, %v6665_v11  ;;  %v2093_v6 = vrot.slane %v1720_v43, %v6665_v11  ;;  %v6779_v62 = vpop.f32.mrf.mxu0 }
 0x15f   : > { %v2387_v10 = vsel %vm1112_vm2, %v1247_v21, %v2073_v15  ;;  %v2388_v12 = vsel %vm1112_vm2, %v1255_v24, %v2077_v0  ;;  %v2390_v31 = vsel %vm1112_vm2, %v1240_v8, %v2085_v3  ;;  %v2399_v32 = vsel %vm1112_vm2, %v1303_v48, %v2121_v14 }
 0x160   : > { %v2097_v4 = vrot.slane %v1722_v25, %v6665_v11  ;;  %v2389_v5 = vsel %vm1112_vm2, %v1257_v37, %v2081_v1  ;;  %v2391_v33 = vsel %vm1112_vm2, %v1254_v22, %v2089_v2  ;;  %v2392_v39 = vsel %vm1112_vm2, %v1256_v27, %v2093_v6 }
 0x161   : > { %v2400_v42 = vsel %vm1112_vm2, %v1305_v29, %v2125_v19  ;;  %v2401_v21 = vsel %vm1112_vm2, %v1307_v30, %v2129_v28  ;;  %v2514_v16 = vcombine.low %v2386_v17, %v2387_v10  ;;  %v2515_v24 = vcombine.low %v2388_v12, %v2389_v5  ;;  %v6815_v12 = vpop.f32.mrf.mxu0 }
 0x162   : > { %v2393_v8 = vsel %vm1112_vm2, %v1258_v38, %v2097_v4  ;;  %v2531_v14 = vcombine.low %v2390_v31, %v2391_v33  ;;  %v2548_v41 = vcombine.low %v2394_v18, %v2395_v52  ;;  %v2549_v44 = vcombine.low %v2396_v60, %v2397_v61  ;;  %v6760_v38 = vpop.f32.mrf.mxu1 }
 0x163   : > { %v2522_v37 = vrot.slane %v2514_v16, %v6667_v13  ;;  %v2529_v22 = vrot.slane %v2515_v24, %v6667_v13  ;;  %v2532_v45 = vcombine.low %v2392_v39, %v2393_v8  ;;  %v2565_v27 = vcombine.low %v2398_v23, %v2399_v32 }
 0x164   : > { %v2539_v19 = vrot.slane %v2531_v14, %v6667_v13  ;;  %v2556_v28 = vrot.slane %v2548_v41, %v6667_v13  ;;  %v2563_v47 = vrot.slane %v2549_v44, %v6667_v13  ;;  %v2566_v48 = vcombine.low %v2400_v42, %v2401_v21  ;;  %v6789_v0 = vpop.f32.mrf.mxu1 }
 0x165   : > { %v2530_v18 = vcombine.low %v2522_v37, %v2529_v22  ;;  %v2546_v29 = vrot.slane %v2532_v45, %v6667_v13  ;;  %v2573_v49 = vrot.slane %v2565_v27, %v6667_v13  ;;  %v1821_v52 = vcombine.high %v6695_v56, %v6695_v56  ;;  %v6837_v27 = vpop.f32.mrf.mxu0 }
 0x166   : > { %v2564_v50 = vcombine.low %v2556_v28, %v2563_v47  ;;  %v2580_v53 = vrot.slane %v2566_v48, %v6667_v13  ;;  %v1828_v55 = vrot.slane %v6695_v56, %v6663_v7  ;;  %v1116_v58 = vrot.slane %v6687_v20, 7  ;;  %v6819_v33 = vpop.f32.mrf.mxu1 }
 0x167   : > { %v2547_v30 = vcombine.low %v2539_v19, %v2546_v29  ;;  %2803 = vst.msk [vmem:[%s6772_s10] sm:$0xff] %vm2802_vm3, %v2530_v18  ;;  %v1835_v54 = vrot.slane %v1821_v52, %v6663_v7  ;;  %v1141_v60 = vrot.slane %v6687_v20, 1  ;;  %v1164_v61 = vmul.f32 0.75, %v6687_v20 }
 0x168   : > { %v2581_v56 = vcombine.low %v2573_v49, %v2580_v53  ;;  %2805 = vst.msk [vmem:[%s6772_s10 + $0x10] sm:$0xff] %vm2802_vm3, %v2564_v50  ;;  %v1836_v43 = vcombine.high %v1828_v55, %v1828_v55  ;;  %v6784_v57 = vrot.slane %v1828_v55, %v6663_v7  ;;  %v1118_v15 = vsel %vm1112_vm2, %v1116_v58, %v1117_v34  ;;  %v6841_v48 = vpop.f32.mrf.mxu1 }
 0x169   : > { %2804 = vst.msk [vmem:[%s6772_s10 + $0x8] sm:$0xff] %vm2802_vm3, %v2547_v30  ;;  %v1837_v3 = vcombine.high %v1835_v54, %v1835_v54  ;;  %v6794_v17 = vrot.slane %v1835_v54, %v6663_v7  ;;  %v1134_v23 = vsel %vm1112_vm2, %v6687_v20, %v1116_v58  ;;  %v1143_v25 = vsel %vm1137_vm1, %v1141_v60, %v1142_v35  ;;  %v6850_v60 = vpop.f32.mrf.mxu0 }
 0x16a   : > { %2806 = vst.msk [vmem:[%s6772_s10 + $0x18] sm:$0xff] %vm2802_vm3, %v2581_v56  ;;  %v1858_v1 = vrot.slane %v1836_v43, %v6663_v7  ;;  %v1866_v34 = vcombine.high %v6784_v57, %v6784_v57  ;;  %v2165_v2 = vrot.slane %v6784_v57, %v6665_v11  ;;  %v1172_v6 = vmul.f32 0.25, %v1134_v23 }
 0x16b   : > { %v6809_v10 = vrot.slane %v1837_v3, %v6663_v7  ;;  %v1867_v20 = vcombine.high %v6794_v17, %v6794_v17  ;;  %v2181_v26 = vrot.slane %v6794_v17, %v6665_v11  ;;  %v1173_v35 = vmul.f32 0.25, %v1118_v15  ;;  %v6853_v15 = vpop.f32.mrf.mxu1 }
 0x16c   : > { %v1868_v31 = vcombine.high %v1858_v1, %v1858_v1  ;;  %v2169_v32 = vrot.slane %v1858_v1, %v6665_v11  ;;  %v2173_v4 = vrot.slane %v1866_v34, %v6665_v11  ;;  %v1180_v5 = vadd.f32 %v1172_v6, %v1164_v61 }
 0x16d   : > { %v1869_v39 = vcombine.high %v6809_v10, %v6809_v10  ;;  %v2185_v42 = vrot.slane %v6809_v10, %v6665_v11  ;;  %v2189_v21 = vrot.slane %v1867_v20, %v6665_v11  ;;  %v1181_v16 = vadd.f32 %v1173_v35, %v6675_v36 }
 0x16e   : > { %v2177_v24 = vrot.slane %v1868_v31, %v6665_v11  ;;  %v1188_v8 = vmul.f32 0.25, %v1143_v25  ;;  %v1308_v14 = vcombine.high %v1180_v5, %v1180_v5  ;;  %v1315_v41 = vrot.slane %v1180_v5, %v6663_v7 }
 0x16f   : > { %v6830_v44 = vrot.slane %v1869_v39, %v6665_v11  ;;  %v1357_v37 = vcombine.high %v1181_v16, %v1181_v16  ;;  %v1364_v22 = vrot.slane %v1181_v16, %v6663_v7  ;;  %v6835_v45 = vadd.f32 %v6747_v40, %v6677_v9  ;;  %v6862_v39 = vpop.f32.mrf.mxu0 }
 0x170   : > { %v1196_v19 = vadd.f32 %v1188_v8, %v1164_v61  ;;  %v1322_v36 = vrot.slane %v1308_v14, %v6663_v7  ;;  %v1323_v28 = vcombine.high %v1315_v41, %v1315_v41  ;;  %v1331_v47 = vrot.slane %v1315_v41, %v6663_v7 }
 0x171   : > { %v1371_v18 = vrot.slane %v1357_v37, %v6663_v7  ;;  %v1372_v29 = vcombine.high %v1364_v22, %v1364_v22  ;;  %v1380_v49 = vrot.slane %v1364_v22, %v6663_v7  ;;  %v1120_v52 = vrot.slane %v6835_v45, 7  ;;  %v6867_v37 = vpop.f32.mrf.mxu1 }
 0x172   : > { %v1324_v50 = vcombine.high %v1322_v36, %v1322_v36  ;;  %v1338_v9 = vrot.slane %v1322_v36, %v6663_v7  ;;  %v1345_v40 = vrot.slane %v1323_v28, %v6663_v7  ;;  %v1353_v53 = vcombine.high %v1331_v47, %v1331_v47 }
 0x173   : > { %v1373_v55 = vcombine.high %v1371_v18, %v1371_v18  ;;  %v1387_v58 = vrot.slane %v1371_v18, %v6663_v7  ;;  %v1394_v30 = vrot.slane %v1372_v29, %v6663_v7  ;;  %v1402_v54 = vcombine.high %v1380_v49, %v1380_v49 }
 0x174   : > { %v1352_v61 = vrot.slane %v1324_v50, %v6663_v7  ;;  %v1354_v56 = vcombine.high %v1338_v9, %v1338_v9  ;;  %v1355_v43 = vcombine.high %v1345_v40, %v1345_v40  ;;  %v1772_v57 = vcombine.high %v1196_v19, %v1196_v19  ;;  %v6878_v50 = vpop.f32.mrf.mxu0 }
 0x175   : > { %v1401_v3 = vrot.slane %v1373_v55, %v6663_v7  ;;  %v1403_v17 = vcombine.high %v1387_v58, %v1387_v58  ;;  %v1404_v23 = vcombine.high %v1394_v30, %v1394_v30  ;;  %v1779_v25 = vrot.slane %v1196_v19, %v6663_v7 }
 0x176   : > { %v1356_v1 = vcombine.high %v1352_v61, %v1352_v61  ;;  %v1786_v34 = vrot.slane %v1772_v57, %v6663_v7  ;;  %v2410_v6 = vsel %vm1112_vm2, %v1380_v49, %v2165_v2  ;;  %v2411_v10 = vsel %vm1112_vm2, %v1394_v30, %v2169_v32 }
 0x177   : > { %v1405_v20 = vcombine.high %v1401_v3, %v1401_v3  ;;  %v1787_v35 = vcombine.high %v1779_v25, %v1779_v25  ;;  %v1795_v31 = vrot.slane %v1779_v25, %v6663_v7  ;;  %v2412_v5 = vsel %vm1112_vm2, %v1402_v54, %v2173_v4  ;;  %v6883_v54 = vpop.f32.mrf.mxu1 }
 0x178   : > { %v1788_v16 = vcombine.high %v1786_v34, %v1786_v34  ;;  %v1802_v8 = vrot.slane %v1786_v34, %v6663_v7  ;;  %v2413_v14 = vsel %vm1112_vm2, %v1404_v23, %v2177_v24  ;;  %v2414_v41 = vsel %vm1112_vm2, %v1387_v58, %v2181_v26 }
 0x179   : > { %v1809_v2 = vrot.slane %v1787_v35, %v6663_v7  ;;  %v1817_v32 = vcombine.high %v1795_v31, %v1795_v31  ;;  %v2133_v22 = vrot.slane %v1795_v31, %v6665_v11  ;;  %v2415_v19 = vsel %vm1112_vm2, %v1401_v3, %v2185_v42 }
 0x17a   : > { %v1816_v4 = vrot.slane %v1788_v16, %v6663_v7  ;;  %v1818_v36 = vcombine.high %v1802_v8, %v1802_v8  ;;  %v2149_v28 = vrot.slane %v1802_v8, %v6665_v11  ;;  %v2416_v18 = vsel %vm1112_vm2, %v1403_v17, %v2189_v21  ;;  %v6894_v8 = vpop.f32.mrf.mxu0 }
 0x17b   : > { %v1819_v29 = vcombine.high %v1809_v2, %v1809_v2  ;;  %v2137_v24 = vrot.slane %v1809_v2, %v6665_v11  ;;  %v2141_v26 = vrot.slane %v1817_v32, %v6665_v11  ;;  %v2402_v49 = vsel %vm1112_vm2, %v1331_v47, %v2133_v22 }
 0x17c   : > { %v1820_v55 = vcombine.high %v1816_v4, %v1816_v4  ;;  %v2153_v58 = vrot.slane %v1816_v4, %v6665_v11  ;;  %v2157_v42 = vrot.slane %v1818_v36, %v6665_v11  ;;  %v2406_v30 = vsel %vm1112_vm2, %v1338_v9, %v2149_v28  ;;  %v6910_v4 = vpop.f32.mrf.mxu0 }
 0x17d   : > { %v2145_v21 = vrot.slane %v1819_v29, %v6665_v11  ;;  %v2403_v57 = vsel %vm1112_vm2, %v1345_v40, %v2137_v24  ;;  %v2404_v3 = vsel %vm1112_vm2, %v1353_v53, %v2141_v26  ;;  %v2417_v47 = vsel %vm1112_vm2, %v1405_v20, %v6830_v44  ;;  %v6898_v20 = vpop.f32.mrf.mxu1 }
 0x17e   : > { %v2161_v17 = vrot.slane %v1820_v55, %v6665_v11  ;;  %v2407_v23 = vsel %vm1112_vm2, %v1352_v61, %v2153_v58  ;;  %v2408_v25 = vsel %vm1112_vm2, %v1354_v56, %v2157_v42  ;;  %v2582_v34 = vcombine.low %v2402_v49, %v2403_v57 }
 0x17f   : > { %v2405_v9 = vsel %vm1112_vm2, %v1355_v43, %v2145_v21  ;;  %v2599_v35 = vcombine.low %v2406_v30, %v2407_v23  ;;  %v2616_v31 = vcombine.low %v2410_v6, %v2411_v10  ;;  %v2617_v16 = vcombine.low %v2412_v5, %v2413_v14  ;;  %v6917_v24 = vpop.f32.mrf.mxu1 }
 0x180   : > { %v2409_v40 = vsel %vm1112_vm2, %v1356_v1, %v2161_v17  ;;  %v2583_v53 = vcombine.low %v2404_v3, %v2405_v9  ;;  %v2590_v2 = vrot.slane %v2582_v34, %v6667_v13  ;;  %v2633_v44 = vcombine.low %v2414_v41, %v2415_v19 }
 0x181   : > { %v2600_v32 = vcombine.low %v2408_v25, %v2409_v40  ;;  %v2607_v61 = vrot.slane %v2599_v35, %v6667_v13  ;;  %v2624_v56 = vrot.slane %v2616_v31, %v6667_v13  ;;  %v2631_v43 = vrot.slane %v2617_v16, %v6667_v13  ;;  %v6947_v17 = vpop.f32.mrf.mxu1 }
 0x182   : > { %v2597_v6 = vrot.slane %v2583_v53, %v6667_v13  ;;  %v2634_v10 = vcombine.low %v2416_v18, %v2417_v47  ;;  %v2641_v5 = vrot.slane %v2633_v44, %v6667_v13  ;;  %v1145_v1 = vrot.slane %v6835_v45, 1 }
 0x183   : > { %v2614_v14 = vrot.slane %v2600_v32, %v6667_v13  ;;  %v2632_v41 = vcombine.low %v2624_v56, %v2631_v43  ;;  %v1167_v22 = vmul.f32 0.75, %v6835_v45  ;;  %v986_v19 = vadd.f32 %v6755_v46, %v6659_v59  ;;  %v6967_v43 = vpop.f32.mrf.mxu1 }
 0x184   : > { %v2598_v36 = vcombine.low %v2590_v2, %v2597_v6  ;;  %v2648_v28 = vrot.slane %v2634_v10, %v6667_v13  ;;  %v1160_v18 = vsel %vm1137_vm1, %v1145_v1, %v6835_v45  ;;  %v1083_v29 = vadd.f32 %v6760_v38, %v6690_v51 }
 0x185   : > { %v2615_v26 = vcombine.low %v2607_v61, %v2614_v14  ;;  %2809 = vst.msk [vmem:[%s6772_s10 + $0x30] sm:$0xff] %vm2802_vm3, %v2632_v41  ;;  %v1191_v49 = vmul.f32 0.25, %v1160_v18  ;;  %v980_v59 = vadd.f32 %v6779_v62, %v6661_v63  ;;  %v6924_v46 = vadd.f32 %v6789_v0, %v986_v19  ;;  %v6935_v63 = vpop.f32.mrf.mxu0 }
 0x186   : > { %v2649_v55 = vcombine.low %v2641_v5, %v2648_v28  ;;  %2807 = vst.msk [vmem:[%s6772_s10 + $0x20] sm:$0xff] %vm2802_vm3, %v2598_v36  ;;  %v1119_v58 = vrot.slane %v1083_v29, 7  ;;  %v1144_v42 = vrot.slane %v1083_v29, 1  ;;  %v1166_v30 = vmul.f32 0.75, %v1083_v29 }
 0x187   : > { %2808 = vst.msk [vmem:[%s6772_s10 + $0x28] sm:$0xff] %vm2802_vm3, %v2615_v26  ;;  %v1199_v51 = vadd.f32 %v1191_v49, %v1167_v22  ;;  %v1123_v38 = vrot.slane %v6924_v46, 7  ;;  %v7812_v21 = vrot.slane %v6924_v46, 1  ;;  %v6933_v57 = vmul.f32 0.75, %v6924_v46  ;;  %v6960_v2 = vpop.f32.mrf.mxu0 }
 0x188   : > { %2810 = vst.msk [vmem:[%s6772_s10 + $0x38] sm:$0xff] %vm2802_vm3, %v2649_v55  ;;  %v1121_v62 = vsel %vm1112_vm2, %v1119_v58, %v1120_v52  ;;  %v1135_v0 = vsel %vm1112_vm2, %v1083_v29, %v1119_v58  ;;  %v1146_v3 = vsel %vm1137_vm1, %v1144_v42, %v1145_v1  ;;  %v6945_v47 = vadd.f32 %v6819_v33, %v980_v59  ;;  %v6990_v42 = vpop.f32.mrf.mxu1 }
 0x189   : > { %v1919_v23 = vcombine.high %v1199_v51, %v1199_v51  ;;  %v1926_v25 = vrot.slane %v1199_v51, %v6663_v7  ;;  %v1174_v34 = vmul.f32 0.25, %v1135_v0  ;;  %v1175_v9 = vmul.f32 0.25, %v1121_v62  ;;  %7826 = vst [vmem:[#allocation16_spill] sm:$0xff] %v6960_v2  ;;  %v6984_v26 = vpop.f32.mrf.mxu0  ;;  %7828 = vst [vmem:[#allocation18_spill] sm:$0xff] %v6990_v42 }
 0x18a   : > { %v1190_v35 = vmul.f32 0.25, %v1146_v3  ;;  %v1161_v45 = vsel %vm1137_vm1, %v7812_v21, %v6924_v46  ;;  %v7813_v52 = vrot.slane %v6945_v47, 7  ;;  %7827 = vst [vmem:[#allocation17_spill] sm:$0xff] %v6984_v26 }
 0x18b   : > { %v1933_v33 = vrot.slane %v1919_v23, %v6663_v7  ;;  %v1934_v16 = vcombine.high %v1926_v25, %v1926_v25  ;;  %v6958_v40 = vrot.slane %v1926_v25, %v6663_v7  ;;  %v1182_v53 = vadd.f32 %v1174_v34, %v1166_v30 }
 0x18c   : > { %v1183_v44 = vadd.f32 %v1175_v9, %v1167_v22  ;;  %v1198_v32 = vadd.f32 %v1190_v35, %v1166_v30  ;;  %v1193_v61 = vmul.f32 0.25, %v1161_v45  ;;  %v6965_v56 = vsel %vm1112_vm2, %v7813_v52, %v1123_v38 }
 0x18d   : > { %v1935_v6 = vcombine.high %v1933_v33, %v1933_v33  ;;  %v6970_v10 = vrot.slane %v1933_v33, %v6663_v7  ;;  %v1956_v5 = vrot.slane %v1934_v16, %v6663_v7  ;;  %v1964_v1 = vcombine.high %v6958_v40, %v6958_v40  ;;  %v7008_v33 = vpop.f32.mrf.mxu0 }
 0x18e   : > { %v2229_v14 = vrot.slane %v6958_v40, %v6665_v11  ;;  %v1406_v41 = vcombine.high %v1182_v53, %v1182_v53  ;;  %v1413_v22 = vrot.slane %v1182_v53, %v6663_v7  ;;  %v1455_v19 = vcombine.high %v1183_v44, %v1183_v44  ;;  %7829 = vst [vmem:[#allocation19_spill] sm:$0xff] %v7008_v33 }
 0x18f   : > { %v6979_v36 = vrot.slane %v1935_v6, %v6663_v7  ;;  %v1965_v28 = vcombine.high %v6970_v10, %v6970_v10  ;;  %v1966_v18 = vcombine.high %v1956_v5, %v1956_v5  ;;  %v2233_v29 = vrot.slane %v1956_v5, %v6665_v11  ;;  %v7011_v5 = vpop.f32.mrf.mxu1  ;;  %v7022_v21 = vpop.f32.mrf.mxu0 }
 0x190   : > { %v2237_v49 = vrot.slane %v1964_v1, %v6665_v11  ;;  %v1420_v55 = vrot.slane %v1406_v41, %v6663_v7  ;;  %v1421_v58 = vcombine.high %v1413_v22, %v1413_v22  ;;  %v1429_v3 = vrot.slane %v1413_v22, %v6663_v7  ;;  %7830 = vst [vmem:[#allocation20_spill] sm:$0xff] %v7011_v5 }
 0x191   : > { %v1967_v30 = vcombine.high %v6979_v36, %v6979_v36  ;;  %v2241_v51 = vrot.slane %v1966_v18, %v6665_v11  ;;  %v6998_v62 = vrot.slane %v1965_v28, %v6665_v11  ;;  %v1462_v9 = vrot.slane %v1183_v44, %v6663_v7  ;;  %7831 = vst [vmem:[#allocation21_spill] sm:$0xff] %v7022_v21  ;;  %v7036_v26 = vpop.f32.mrf.mxu0 }
 0x192   : > { %v1422_v0 = vcombine.high %v1420_v55, %v1420_v55  ;;  %v1436_v23 = vrot.slane %v1420_v55, %v6663_v7  ;;  %v1443_v25 = vrot.slane %v1421_v58, %v6663_v7  ;;  %v1469_v35 = vrot.slane %v1455_v19, %v6663_v7 }
 0x193   : > { %v7004_v34 = vrot.slane %v1967_v30, %v6665_v11  ;;  %v1870_v45 = vcombine.high %v1198_v32, %v1198_v32  ;;  %v1451_v40 = vcombine.high %v1429_v3, %v1429_v3  ;;  %v1470_v1 = vcombine.high %v1462_v9, %v1462_v9 }
 0x194   : > { %v1450_v16 = vrot.slane %v1422_v0, %v6663_v7  ;;  %v1452_v53 = vcombine.high %v1436_v23, %v1436_v23  ;;  %v1453_v6 = vcombine.high %v1443_v25, %v1443_v25  ;;  %v1471_v41 = vcombine.high %v1469_v35, %v1469_v35 }
 0x195   : > { %v1478_v22 = vrot.slane %v1462_v9, %v6663_v7  ;;  %v1485_v28 = vrot.slane %v1469_v35, %v6663_v7  ;;  %v1877_v44 = vrot.slane %v1198_v32, %v6663_v7  ;;  %v1884_v19 = vrot.slane %v1870_v45, %v6663_v7  ;;  %v7026_v32 = vpop.f32.mrf.mxu1 }
 0x196   : > { %v1454_v18 = vcombine.high %v1450_v16, %v1450_v16  ;;  %v7018_v55 = vadd.f32 %v1193_v61, %v6933_v57  ;;  %v1492_v58 = vrot.slane %v1470_v1, %v6663_v7  ;;  %v1499_v30 = vrot.slane %v1471_v41, %v6663_v7  ;;  %7832 = vst [vmem:[#allocation22_spill] sm:$0xff] %v7026_v32 }
 0x197   : > { %v1500_v0 = vcombine.high %v1478_v22, %v1478_v22  ;;  %v1501_v31 = vcombine.high %v1485_v28, %v1485_v28  ;;  %v1885_v52 = vcombine.high %v1877_v44, %v1877_v44  ;;  %v1886_v9 = vcombine.high %v1884_v19, %v1884_v19 }
 0x198   : > { %v1893_v35 = vrot.slane %v1877_v44, %v6663_v7  ;;  %v1900_v38 = vrot.slane %v1884_v19, %v6663_v7  ;;  %v1502_v45 = vcombine.high %v1492_v58, %v1492_v58  ;;  %v1503_v59 = vcombine.high %v1499_v30, %v1499_v30 }
 0x199   : > { %v2426_v61 = vsel %vm1112_vm2, %v1478_v22, %v2229_v14  ;;  %v2427_v1 = vsel %vm1112_vm2, %v1492_v58, %v2233_v29  ;;  %v1907_v41 = vrot.slane %v1885_v52, %v6663_v7  ;;  %v1914_v5 = vrot.slane %v1886_v9, %v6663_v7  ;;  %v7040_v22 = vpop.f32.mrf.mxu1 }
 0x19a   : > { %v1915_v42 = vcombine.high %v1893_v35, %v1893_v35  ;;  %v1916_v21 = vcombine.high %v1900_v38, %v1900_v38  ;;  %v2197_v33 = vrot.slane %v1893_v35, %v6665_v11  ;;  %v2213_v44 = vrot.slane %v1900_v38, %v6665_v11 }
 0x19b   : > { %v2428_v19 = vsel %vm1112_vm2, %v1500_v0, %v2237_v49  ;;  %v2429_v32 = vsel %vm1112_vm2, %v1502_v45, %v2241_v51  ;;  %v1917_v2 = vcombine.high %v1907_v41, %v1907_v41  ;;  %v1918_v14 = vcombine.high %v1914_v5, %v1914_v5 }
 0x19c   : > { %v2201_v29 = vrot.slane %v1907_v41, %v6665_v11  ;;  %v2205_v52 = vrot.slane %v1915_v42, %v6665_v11  ;;  %v2217_v58 = vrot.slane %v1914_v5, %v6665_v11  ;;  %v2221_v9 = vrot.slane %v1916_v21, %v6665_v11 }
 0x19d   : > { %v2418_v38 = vsel %vm1112_vm2, %v1429_v3, %v2197_v33  ;;  %v2422_v49 = vsel %vm1112_vm2, %v1436_v23, %v2213_v44  ;;  %v2209_v51 = vrot.slane %v1917_v2, %v6665_v11  ;;  %v2225_v0 = vrot.slane %v1918_v14, %v6665_v11  ;;  %v7060_v23 = vpop.f32.mrf.mxu0 }
 0x19e   : > { %v2419_v35 = vsel %vm1112_vm2, %v1443_v25, %v2201_v29  ;;  %v2420_v45 = vsel %vm1112_vm2, %v1451_v40, %v2205_v52  ;;  %v2423_v42 = vsel %vm1112_vm2, %v1450_v16, %v2217_v58  ;;  %v2424_v41 = vsel %vm1112_vm2, %v1452_v53, %v2221_v9 }
 0x19f   : > { %v7833_v5 = vrot.slane %v6970_v10, %v6665_v11  ;;  %v7834_v3 = vrot.slane %v6979_v36, %v6665_v11  ;;  %v2421_v25 = vsel %vm1112_vm2, %v1453_v6, %v2209_v51  ;;  %v2425_v33 = vsel %vm1112_vm2, %v1454_v18, %v2225_v0  ;;  %v7068_v10 = vpop.f32.mrf.mxu1 }
 0x1a0   : > { %v2432_v16 = vsel %vm1112_vm2, %v1501_v31, %v6998_v62  ;;  %v2433_v40 = vsel %vm1112_vm2, %v1503_v59, %v7004_v34  ;;  %7835 = vst [vmem:[#allocation23_spill] sm:$0xff] %v7068_v10  ;;  %v2650_v53 = vcombine.low %v2418_v38, %v2419_v35  ;;  %v2667_v44 = vcombine.low %v2422_v49, %v2423_v42  ;;  %v7074_v59 = vpop.f32.mrf.mxu0 }
 0x1a1   : > { %v2430_v21 = vsel %vm1112_vm2, %v1485_v28, %v7833_v5  ;;  %v2431_v2 = vsel %vm1112_vm2, %v1499_v30, %v7834_v3  ;;  %v2651_v28 = vcombine.low %v2420_v45, %v2421_v25  ;;  %v2668_v36 = vcombine.low %v2424_v41, %v2425_v33 }
 0x1a2   : > { %v2684_v14 = vcombine.low %v2426_v61, %v2427_v1  ;;  %v2685_v30 = vcombine.low %v2428_v19, %v2429_v32  ;;  %v2701_v29 = vcombine.low %v2430_v21, %v2431_v2  ;;  %v2702_v52 = vcombine.low %v2432_v16, %v2433_v40  ;;  %v7080_v1 = vpop.f32.mrf.mxu1  ;;  %v7104_v25 = vpop.f32.mrf.mxu0 }
 0x1a3   : > { %v2658_v6 = vrot.slane %v2650_v53, %v6667_v13  ;;  %v2665_v18 = vrot.slane %v2651_v28, %v6667_v13  ;;  %v2675_v58 = vrot.slane %v2667_v44, %v6667_v13  ;;  %v2682_v31 = vrot.slane %v2668_v36, %v6667_v13  ;;  %7836 = vst [vmem:[#allocation24_spill] sm:$0xff] %v7080_v1 }
 0x1a4   : > { %v2692_v62 = vrot.slane %v2684_v14, %v6667_v13  ;;  %v2699_v34 = vrot.slane %v2685_v30, %v6667_v13  ;;  %v2709_v32 = vrot.slane %v2701_v29, %v6667_v13  ;;  %v2716_v61 = vrot.slane %v2702_v52, %v6667_v13  ;;  %v7115_v53 = vpop.f32.mrf.mxu1 }
 0x1a5   : > { %v2666_v19 = vcombine.low %v2658_v6, %v2665_v18  ;;  %v2683_v9 = vcombine.low %v2675_v58, %v2682_v31  ;;  %v2017_v38 = vcombine.high %v7018_v55, %v7018_v55  ;;  %v2024_v49 = vrot.slane %v7018_v55, %v6663_v7  ;;  %7840 = vst [vmem:[#allocation25_spill] sm:$0xff] %v7115_v53  ;;  %v7137_v18 = vpop.f32.mrf.mxu0 }
 0x1a6   : > { %v2700_v51 = vcombine.low %v2692_v62, %v2699_v34  ;;  %v2717_v0 = vcombine.low %v2709_v32, %v2716_v61  ;;  %v7837_v35 = vrot.slane %v6945_v47, 7  ;;  %v7838_v42 = vrot.slane %v6924_v46, 1  ;;  %7841 = vst [vmem:[#allocation26_spill] sm:$0xff] %v7137_v18  ;;  %v7145_v34 = vpop.f32.mrf.mxu1 }
 0x1a7   : > { %v7839_v41 = vrot.slane %v6945_v47, 1  ;;  %2811 = vst.msk [vmem:[%s6772_s10 + $0x40] sm:$0xff] %vm2802_vm3, %v2666_v19  ;;  %2812 = vst.msk [vmem:[%s6772_s10 + $0x48] sm:$0xff] %vm2802_vm3, %v2683_v9  ;;  %v2031_v21 = vrot.slane %v2017_v38, %v6663_v7  ;;  %v2032_v55 = vcombine.high %v2024_v49, %v2024_v49  ;;  %v7101_v3 = vrot.slane %v2024_v49, %v6663_v7 }
 0x1a8   : > { %v1136_v45 = vsel %vm1112_vm2, %v6945_v47, %v7837_v35  ;;  %v1168_v2 = vmul.f32 0.75, %v6945_v47  ;;  %2813 = vst.msk [vmem:[%s6772_s10 + $0x50] sm:$0xff] %vm2802_vm3, %v2700_v51  ;;  %2814 = vst.msk [vmem:[%s6772_s10 + $0x58] sm:$0xff] %vm2802_vm3, %v2717_v0  ;;  %v1177_v33 = vmul.f32 0.25, %v6965_v56  ;;  %v7113_v40 = vadd.f32 %v6841_v48, %v6815_v12 }
 0x1a9   : > { %v1149_v5 = vsel %vm1137_vm1, %v7839_v41, %v7838_v42  ;;  %v1176_v46 = vmul.f32 0.25, %v1136_v45  ;;  %v2033_v28 = vcombine.high %v2031_v21, %v2031_v21  ;;  %v7118_v44 = vrot.slane %v2031_v21, %v6663_v7  ;;  %7842 = vst [vmem:[#allocation27_spill] sm:$0xff] %v7145_v34 }
 0x1aa   : > { %v1192_v16 = vmul.f32 0.25, %v1149_v5  ;;  %v7121_v47 = vrot.slane %v2032_v55, %v6663_v7  ;;  %v2062_v36 = vcombine.high %v7101_v3, %v7101_v3  ;;  %v1185_v30 = vadd.f32 %v1177_v33, %v6933_v57  ;;  %v7164_v5 = vpop.f32.mrf.mxu0  ;;  %v7168_v33 = vpop.f32.mrf.mxu1 }
 0x1ab   : > { %v1184_v14 = vadd.f32 %v1176_v46, %v1168_v2  ;;  %v7129_v48 = vrot.slane %v2033_v28, %v6663_v7  ;;  %v2063_v29 = vcombine.high %v7118_v44, %v7118_v44  ;;  %7843 = vst [vmem:[#allocation28_spill] sm:$0xff] %v7164_v5  ;;  %7844 = vst [vmem:[#allocation29_spill] sm:$0xff] %v7168_v33 }
 0x1ac   : > { %v1200_v12 = vadd.f32 %v1192_v16, %v1168_v2  ;;  %v2064_v52 = vcombine.high %v7121_v47, %v7121_v47  ;;  %v7140_v58 = vrot.slane %v2062_v36, %v6665_v11  ;;  %v1553_v0 = vcombine.high %v1185_v30, %v1185_v30 }
 0x1ad   : > { %v1504_v31 = vcombine.high %v1184_v14, %v1184_v14  ;;  %v1511_v62 = vrot.slane %v1184_v14, %v6663_v7  ;;  %v2065_v32 = vcombine.high %v7129_v48, %v7129_v48  ;;  %v7155_v9 = vrot.slane %v2063_v29, %v6665_v11 }
 0x1ae   : > { %v7150_v61 = vrot.slane %v2064_v52, %v6665_v11  ;;  %v1560_v45 = vrot.slane %v1185_v30, %v6663_v7  ;;  %v1968_v42 = vcombine.high %v1200_v12, %v1200_v12  ;;  %v1975_v41 = vrot.slane %v1200_v12, %v6663_v7 }
 0x1af   : > { %v1518_v38 = vrot.slane %v1504_v31, %v6663_v7  ;;  %v1519_v49 = vcombine.high %v1511_v62, %v1511_v62  ;;  %v1527_v51 = vrot.slane %v1511_v62, %v6663_v7  ;;  %v7160_v35 = vrot.slane %v2065_v32, %v6665_v11 }
 0x1b0   : > { %v1567_v16 = vrot.slane %v1553_v0, %v6663_v7  ;;  %v1568_v28 = vcombine.high %v1560_v45, %v1560_v45  ;;  %v1576_v36 = vrot.slane %v1560_v45, %v6663_v7  ;;  %v1982_v14 = vrot.slane %v1968_v42, %v6663_v7  ;;  %v7180_v42 = vpop.f32.mrf.mxu1 }
 0x1b1   : > { %v1520_v21 = vcombine.high %v1518_v38, %v1518_v38  ;;  %v1534_v55 = vrot.slane %v1518_v38, %v6663_v7  ;;  %v1541_v2 = vrot.slane %v1519_v49, %v6663_v7  ;;  %v1549_v46 = vcombine.high %v1527_v51, %v1527_v51  ;;  %v7176_v49 = vpop.f32.mrf.mxu0  ;;  %7846 = vst [vmem:[#allocation31_spill] sm:$0xff] %v7180_v42 }
 0x1b2   : > { %v1983_v52 = vcombine.high %v1975_v41, %v1975_v41  ;;  %v1569_v31 = vcombine.high %v1567_v16, %v1567_v16  ;;  %v1583_v62 = vrot.slane %v1567_v16, %v6663_v7  ;;  %v1590_v32 = vrot.slane %v1568_v28, %v6663_v7  ;;  %7845 = vst [vmem:[#allocation30_spill] sm:$0xff] %v7176_v49 }
 0x1b3   : > { %v1548_v30 = vrot.slane %v1520_v21, %v6663_v7  ;;  %v1550_v12 = vcombine.high %v1534_v55, %v1534_v55  ;;  %v1551_v29 = vcombine.high %v1541_v2, %v1541_v2  ;;  %v1598_v38 = vcombine.high %v1576_v36, %v1576_v36  ;;  %v7188_v53 = vpop.f32.mrf.mxu0 }
 0x1b4   : > { %v1984_v0 = vcombine.high %v1982_v14, %v1982_v14  ;;  %v1991_v57 = vrot.slane %v1975_v41, %v6663_v7  ;;  %v1998_v45 = vrot.slane %v1982_v14, %v6663_v7  ;;  %v1597_v21 = vrot.slane %v1569_v31, %v6663_v7  ;;  %7847 = vst [vmem:[#allocation32_spill] sm:$0xff] %v7188_v53 }
 0x1b5   : > { %v1552_v19 = vcombine.high %v1548_v30, %v1548_v30  ;;  %v1599_v6 = vcombine.high %v1583_v62, %v1583_v62  ;;  %v1600_v56 = vcombine.high %v1590_v32, %v1590_v32  ;;  %v2005_v33 = vrot.slane %v1983_v52, %v6663_v7 }
 0x1b6   : > { %v2012_v16 = vrot.slane %v1984_v0, %v6663_v7  ;;  %v2013_v28 = vcombine.high %v1991_v57, %v1991_v57  ;;  %v2014_v5 = vcombine.high %v1998_v45, %v1998_v45  ;;  %v2261_v49 = vrot.slane %v1991_v57, %v6665_v11  ;;  %v7193_v0 = vpop.f32.mrf.mxu1 }
 0x1b7   : > { %v1601_v18 = vcombine.high %v1597_v21, %v1597_v21  ;;  %v2015_v34 = vcombine.high %v2005_v33, %v2005_v33  ;;  %v2265_v41 = vrot.slane %v2005_v33, %v6665_v11  ;;  %v2277_v14 = vrot.slane %v1998_v45, %v6665_v11  ;;  %7848 = vst [vmem:[#allocation33_spill] sm:$0xff] %v7193_v0 }
 0x1b8   : > { %v2016_v42 = vcombine.high %v2012_v16, %v2012_v16  ;;  %v2269_v31 = vrot.slane %v2013_v28, %v6665_v11  ;;  %v2281_v1 = vrot.slane %v2012_v16, %v6665_v11  ;;  %v2285_v52 = vrot.slane %v2014_v5, %v6665_v11 }
 0x1b9   : > { %v2273_v7 = vrot.slane %v2015_v34, %v6665_v11  ;;  %v2434_v57 = vsel %vm1112_vm2, %v1527_v51, %v2261_v49  ;;  %v2435_v10 = vsel %vm1112_vm2, %v1541_v2, %v2265_v41  ;;  %v2438_v33 = vsel %vm1112_vm2, %v1534_v55, %v2277_v14 }
 0x1ba   : > { %v2289_v45 = vrot.slane %v2016_v42, %v6665_v11  ;;  %v2436_v53 = vsel %vm1112_vm2, %v1549_v46, %v2269_v31  ;;  %v2439_v28 = vsel %vm1112_vm2, %v1548_v30, %v2281_v1  ;;  %v2440_v16 = vsel %vm1112_vm2, %v1550_v12, %v2285_v52  ;;  %v7214_v46 = vpop.f32.mrf.mxu0  ;;  %v7227_v12 = vpop.f32.mrf.mxu1 }
 0x1bb   : > { %v2437_v5 = vsel %vm1112_vm2, %v1551_v29, %v2273_v7  ;;  %v7849_v0 = vrot.slane %v7101_v3, %v6665_v11  ;;  %v7850_v51 = vrot.slane %v7121_v47, %v6665_v11  ;;  %v2444_v2 = vsel %vm1112_vm2, %v1598_v38, %v7140_v58 }
 0x1bc   : > { %v2441_v1 = vsel %vm1112_vm2, %v1552_v19, %v2289_v45  ;;  %v2445_v7 = vsel %vm1112_vm2, %v1600_v56, %v7150_v61  ;;  %v7851_v3 = vrot.slane %v7118_v44, %v6665_v11  ;;  %v7852_v47 = vrot.slane %v7129_v48, %v6665_v11 }
 0x1bd   : > { %v2442_v34 = vsel %vm1112_vm2, %v1576_v36, %v7849_v0  ;;  %v2443_v55 = vsel %vm1112_vm2, %v1590_v32, %v7850_v51  ;;  %v2448_v58 = vsel %vm1112_vm2, %v1599_v6, %v7155_v9  ;;  %v2449_v19 = vsel %vm1112_vm2, %v1601_v18, %v7160_v35 }
 0x1be   : > { %v2446_v36 = vsel %vm1112_vm2, %v1583_v62, %v7851_v3  ;;  %v2447_v30 = vsel %vm1112_vm2, %v1597_v21, %v7852_v47  ;;  %v2718_v29 = vcombine.low %v2434_v57, %v2435_v10  ;;  %v2719_v56 = vcombine.low %v2436_v53, %v2437_v5  ;;  %v3474_v21 = vpop.f32.mrf.mxu0  ;;  %v5858_v53 = vpop.f32.mrf.mxu1 }
 0x1bf   : > { %v2735_v61 = vcombine.low %v2438_v33, %v2439_v28  ;;  %v2736_v32 = vcombine.low %v2440_v16, %v2441_v1  ;;  %v2752_v44 = vcombine.low %v2442_v34, %v2443_v55  ;;  %v2753_v38 = vcombine.low %v2444_v2, %v2445_v7  ;;  %v7857_v55 = vld [vmem:[#allocation18_spill] sm:$0xff] }
 0x1c0   : > { %v2726_v62 = vrot.slane %v2718_v29, %v6667_v13  ;;  %v2733_v48 = vrot.slane %v2719_v56, %v6667_v13  ;;  %v2769_v49 = vcombine.low %v2446_v36, %v2447_v30  ;;  %v2770_v42 = vcombine.low %v2448_v58, %v2449_v19  ;;  %v3589_v34 = vpop.f32.mrf.mxu1  ;;  %v7860_v36 = vld [vmem:[#allocation23_spill] sm:$0xff]  ;;  %v7861_v30 = vld [vmem:[#allocation24_spill] sm:$0xff]  ;;  %v7862_v19 = vld [vmem:[#allocation25_spill] sm:$0xff] }
 0x1c1   : > { %v2743_v41 = vrot.slane %v2735_v61, %v6667_v13  ;;  %v2750_v6 = vrot.slane %v2736_v32, %v6667_v13  ;;  %v2760_v18 = vrot.slane %v2752_v44, %v6667_v13  ;;  %v2767_v10 = vrot.slane %v2753_v38, %v6667_v13  ;;  %v7863_v29 = vld [vmem:[#allocation27_spill] sm:$0xff]  ;;  %v7864_v56 = vld [vmem:[#allocation26_spill] sm:$0xff]  ;;  %v7865_v32 = vld [vmem:[#allocation28_spill] sm:$0xff] }
 0x1c2   : > { %v2734_v9 = vcombine.low %v2726_v62, %v2733_v48  ;;  %v2777_v35 = vrot.slane %v2769_v49, %v6667_v13  ;;  %v2784_v14 = vrot.slane %v2770_v42, %v6667_v13  ;;  %v3076_v31 = vadd.f32 %v6853_v15, %v6837_v27  ;;  %v5845_v15 = vpop.f32.mrf.mxu0  ;;  %v7866_v38 = vld [vmem:[#allocation30_spill] sm:$0xff] }
 0x1c3   : > { %v2751_v52 = vcombine.low %v2743_v41, %v2750_v6  ;;  %v2768_v0 = vcombine.low %v2760_v18, %v2767_v10  ;;  %v3094_v57 = vadd.f32 %v6867_v37, %v6850_v60  ;;  %v3088_v33 = vadd.f32 %v6883_v54, %v6862_v39  ;;  %v7853_v39 = vld [vmem:[#allocation16_spill] sm:$0xff]  ;;  %v7854_v54 = vld [vmem:[#allocation17_spill] sm:$0xff]  ;;  %v7869_v10 = vld [vmem:[#allocation31_spill] sm:$0xff] }
 0x1c4   : > { %v2785_v45 = vcombine.low %v2777_v35, %v2784_v14  ;;  %2815 = vst.msk [vmem:[%s6772_s10 + $0x60] sm:$0xff] %vm2802_vm3, %v2734_v9  ;;  %v3106_v28 = vadd.f32 %v6898_v20, %v6878_v50  ;;  %v3100_v16 = vadd.f32 %v6917_v24, %v6894_v8  ;;  %v3118_v27 = vadd.f32 %v6947_v17, %v6910_v4  ;;  %v7855_v50 = vld [vmem:[#allocation19_spill] sm:$0xff]  ;;  %v7856_v8 = vld [vmem:[#allocation21_spill] sm:$0xff] }
 0x1c5   : > { %2816 = vst.msk [vmem:[%s6772_s10 + $0x68] sm:$0xff] %vm2802_vm3, %v2751_v52  ;;  %2817 = vst.msk [vmem:[%s6772_s10 + $0x70] sm:$0xff] %vm2802_vm3, %v2768_v0  ;;  %v3112_v60 = vadd.f32 %v6967_v43, %v6935_v63  ;;  %v3201_v37 = vadd.f32 %v7853_v39, %v7113_v40  ;;  %v3194_v5 = vadd.f32 %v7854_v54, %v3076_v31  ;;  %v7858_v43 = vld [vmem:[#allocation20_spill] sm:$0xff]  ;;  %v7859_v40 = vld [vmem:[#allocation22_spill] sm:$0xff] }
 0x1c6   : > { %v3215_v20 = vadd.f32 %v7855_v50, %v3094_v57  ;;  %2818 = vst.msk [vmem:[%s6772_s10 + $0x78] sm:$0xff] %vm2802_vm3, %v2785_v45  ;;  %v3208_v4 = vadd.f32 %v7856_v8, %v3088_v33  ;;  %v3229_v24 = vadd.f32 %v7036_v26, %v3106_v28  ;;  %v3222_v17 = vadd.f32 %v7060_v23, %v3100_v16  ;;  %v3486_v23 = vpop.f32.mrf.mxu0  ;;  %v7868_v6 = vld [vmem:[#allocation29_spill] sm:$0xff] }
 0x1c7   : > { %v3243_v51 = vadd.f32 %v7074_v59, %v3118_v27  ;;  %v3326_v63 = vadd.f32 %v7857_v55, %v3201_v37  ;;  %v3318_v2 = vadd.f32 %v7858_v43, %v3194_v5  ;;  %v3236_v7 = vadd.f32 %v7104_v25, %v3112_v60  ;;  %v5861_v25 = vpop.f32.mrf.mxu1  ;;  %v7870_v35 = vld [vmem:[#allocation33_spill] sm:$0xff] }
 0x1c8   : > { %v3342_v1 = vadd.f32 %v7859_v40, %v3215_v20  ;;  %v3334_v3 = vadd.f32 %v7040_v22, %v3208_v4  ;;  %v3358_v47 = vadd.f32 %v7860_v36, %v3229_v24  ;;  %v3350_v58 = vadd.f32 %v7861_v30, %v3222_v17  ;;  %v7867_v22 = vld [vmem:[#allocation32_spill] sm:$0xff] }
 0x1c9   : > { %v3374_v26 = vadd.f32 %v7862_v19, %v3243_v51  ;;  %v3366_v59 = vadd.f32 %v7863_v29, %v3236_v7  ;;  %v3457_v61 = vadd.f32 %v7864_v56, %v3326_v63  ;;  %v3451_v44 = vadd.f32 %v7865_v32, %v3318_v2 }
 0x1ca   : > { %v3469_v62 = vadd.f32 %v7866_v38, %v3342_v1  ;;  %v3463_v48 = vadd.f32 %v7867_v22, %v3334_v3  ;;  %v3481_v49 = vadd.f32 %v7214_v46, %v3358_v47  ;;  %v3475_v42 = vadd.f32 %v3474_v21, %v3350_v58 }
 0x1cb   : > { %v3493_v41 = vadd.f32 %v5845_v15, %v3374_v26  ;;  %v3572_v18 = vadd.f32 %v7868_v6, %v3457_v61  ;;  %v3566_v9 = vadd.f32 %v7869_v10, %v3451_v44  ;;  %v7290_v31 = vadd.f32 %v3486_v23, %v3366_v59 }
 0x1cc   : > { %v7288_v14 = vadd.f32 %v7870_v35, %v3469_v62  ;;  %v7294_v52 = vadd.f32 %v7227_v12, %v3463_v48  ;;  %v7296_v0 = vadd.f32 %v5858_v53, %v3481_v49  ;;  %v7298_v57 = vadd.f32 %v3589_v34, %v3475_v42 }
 0x1cd   : > { %v7300_v46 = vadd.f32 %v5861_v25, %v3493_v41  ;;  %v3620_v21 = vrot.slane %v3572_v18, 7  ;;  %v3644_v33 = vrot.slane %v3572_v18, 1  ;;  %v3668_v45 = vmul.f32 0.75, %v3572_v18 }
 0x1ce   : > { %v3619_v12 = vrot.slane %v3566_v9, 7  ;;  %v3643_v53 = vrot.slane %v3566_v9, 1  ;;  %v3667_v28 = vmul.f32 0.75, %v3566_v9  ;;  %v3623_v16 = vrot.slane %v7288_v14, 7 }
 0x1cf   : > { %v3647_v27 = vrot.slane %v7288_v14, 1  ;;  %v3663_v15 = vsel %vm1137_vm1, %v3644_v33, %v3572_v18  ;;  %v7318_v37 = vmul.f32 0.75, %v7288_v14 }
 0x1d0   : > { %v3621_v60 = vsel %vm1112_vm2, %v3619_v12, %v3620_v21  ;;  %v3639_v39 = vsel %vm1112_vm2, %v3566_v9, %v3619_v12 }
 0x1d1   : > { %6046 = shalt.err (!%p6043_p9)
}
 0x1d2   : > { %s6047_s22 = scalar_lea.hbm %s7307_s24, 2048  ;;  %s6051_s10 = scalar_lea.hbm %s7808_s3, 4096 }
 0x1d3   : > { %p6048_p3 = scmp.ne.s32.totalorder %s7307_s24, %s6047_s22  ;;  %p6052_p0 = scmp.lt.s32.totalorder %s7307_s24, %s7808_s3 }
 0x1d4   : > { %p6053_p4 = scmp.lt.s32.totalorder %s6051_s10, %s6047_s22 }
 0x1d5   : > { %p6049_p5 = pnand %p6048_p3, %p7871_p12 }
 0x1d6   : > { %p6054_p7 = por %p6053_p4, %p6052_p0 }
 0x1d7   : > { %p6050_p10 = pneg %p6049_p5 }
 0x1d9   : > { %p6055_p11 = pnand %p6054_p7, %p6050_p10 }
 0x1db   : > { %6058 = shalt.err (!%p6055_p11)
}
 0x1dc   : > { %s6157_s9 = smov 128   ;;  %s6158_s12 = smov 8   ;;  %v3692_v54 = vmul.f32 0.25, %v3663_v15  ;;  %v3645_v5 = vsel %vm1137_vm1, %v3643_v53, %v3644_v33  ;;  %v3675_v50 = vmul.f32 0.25, %v3639_v39  ;;  %v3676_v20 = vmul.f32 0.25, %v3621_v60  ;;  %v7872_v3 = vld [vmem:[#allocation15_spill] sm:$0xff] }
 0x1dd   : > { %5870 = dma.vmem_to_hbm [thread:$0]  (%p7871_p12), %s7310_s29, 2048, %s7307_s24, %s5324_s7, %s6157_s9, %s6157_s9, %s6158_s12   ;;  %v3691_v34 = vmul.f32 0.25, %v3645_v5  ;;  %v3664_v8 = vsel %vm1137_vm1, %v3647_v27, %v7288_v14  ;;  %v3622_v4 = vrot.slane %v7294_v52, 7  ;;  %v3646_v24 = vrot.slane %v7294_v52, 1 }
 0x1de   : > { %v3700_v17 = vadd.f32 %v3692_v54, %v3668_v45  ;;  %v3683_v51 = vadd.f32 %v3675_v50, %v3667_v28  ;;  %v3684_v55 = vadd.f32 %v3676_v20, %v3668_v45  ;;  %v7351_v63 = vmul.f32 0.25, %v3664_v8  ;;  %s7434_s24 = scalar_lea.vmem [#allocation9], %s5536_s5  ;;  %s7746_s13 = scalar_lea.hbm %s7809_s4, %s5548_s8 }
 0x1df   : > { %v3699_v43 = vadd.f32 %v3691_v34, %v3667_v28  ;;  %v7354_v2 = vsel %vm1112_vm2, %v3622_v4, %v3623_v16  ;;  %v7358_v40 = vsel %vm1112_vm2, %v7294_v52, %v3622_v4  ;;  %v7361_v1 = vsel %vm1137_vm1, %v3646_v24, %v3647_v27  ;;  %s5364_s5 = sshll.u32 %s7434_s24, 4  ;;  %s5329_s11 = scalar_lea.sflag [#allocation10], %s6332_s30  ;;  %s7748_s5 = int_to_ptr.vmem [resolvable:$true] %s5364_s5 }
 0x1e0   : > { %v4228_v7 = vcombine.high %v3700_v17, %v3700_v17  ;;  %v4235_v36 = vrot.slane %v3700_v17, %v7872_v3  ;;  %v3715_v47 = vcombine.high %v3683_v51, %v3683_v51  ;;  %v3722_v30 = vrot.slane %v3683_v51, %v7872_v3  ;;  %s6059_s18 = scalar_lea.vmem %s7748_s5, 2048  ;;  %s6159_s8 = smov [#allocation9]  }
 0x1e1   : > { %v3764_v58 = vcombine.high %v3684_v55, %v3684_v55  ;;  %v3771_v19 = vrot.slane %v3684_v55, %v7872_v3  ;;  %v4179_v26 = vcombine.high %v3699_v43, %v3699_v43  ;;  %v4186_v23 = vrot.slane %v3699_v43, %v7872_v3  ;;  %p6060_p13 = scmp.ne.s32.totalorder %s7748_s5, %s6059_s18  ;;  %s6063_s22 = sshll.u32 %s6159_s8, 4  ;;  %s6064_s22 = int_to_ptr.vmem [resolvable:$false] %s6063_s22 }
 0x1e2   : > { %v4242_v29 = vrot.slane %v4228_v7, %v7872_v3  ;;  %v4243_v59 = vcombine.high %v4235_v36, %v4235_v36  ;;  %v4251_v56 = vrot.slane %v4235_v36, %v7872_v3  ;;  %v3729_v61 = vrot.slane %v3715_v47, %v7872_v3  ;;  %s6065_s26 = scalar_lea.vmem %s6064_s22, 4096  ;;  %p6066_p1 = scmp.lt.s32.totalorder %s7748_s5, %s6064_s22 }
 0x1e3   : > { %v3730_v32 = vcombine.high %v3722_v30, %v3722_v30  ;;  %v3738_v44 = vrot.slane %v3722_v30, %v7872_v3  ;;  %v3778_v38 = vrot.slane %v3764_v58, %v7872_v3  ;;  %v3779_v62 = vcombine.high %v3771_v19, %v3771_v19  ;;  %p6061_p2 = pnand %p6060_p13, %p7871_p12  ;;  %p6067_p6 = scmp.lt.s32.totalorder %s6065_s26, %s6059_s18 }
 0x1e4   : > { %v4244_v25 = vcombine.high %v4242_v29, %v4242_v29  ;;  %v4258_v22 = vrot.slane %v4242_v29, %v7872_v3  ;;  %v4265_v48 = vrot.slane %v4243_v59, %v7872_v3  ;;  %v4273_v49 = vcombine.high %v4251_v56, %v4251_v56 }
 0x1e5   : > { %v4606_v42 = vrot.slane %v4251_v56, %v6665_v11  ;;  %v3731_v41 = vcombine.high %v3729_v61, %v3729_v61  ;;  %v3745_v6 = vrot.slane %v3729_v61, %v7872_v3  ;;  %v3752_v18 = vrot.slane %v3730_v32, %v7872_v3  ;;  %p6062_p8 = pneg %p6061_p2  ;;  %p6068_p9 = por %p6067_p6, %p6066_p1 }
 0x1e6   : > { %v4272_v10 = vrot.slane %v4244_v25, %v7872_v3  ;;  %v4274_v9 = vcombine.high %v4258_v22, %v4258_v22  ;;  %v4275_v35 = vcombine.high %v4265_v48, %v4265_v48  ;;  %v4610_v14 = vrot.slane %v4265_v48, %v6665_v11 }
 0x1e7   : > { %v4614_v21 = vrot.slane %v4273_v49, %v6665_v11  ;;  %v4622_v33 = vrot.slane %v4258_v22, %v6665_v11  ;;  %v3759_v45 = vrot.slane %v3731_v41, %v7872_v3  ;;  %v3760_v12 = vcombine.high %v3738_v44, %v3738_v44  ;;  %p6069_p3 = pnand %p6068_p9, %p6062_p8 }
 0x1e8   : > { %v4276_v53 = vcombine.high %v4272_v10, %v4272_v10  ;;  %v4618_v28 = vrot.slane %v4275_v35, %v6665_v11  ;;  %v4626_v16 = vrot.slane %v4272_v10, %v6665_v11  ;;  %v4630_v27 = vrot.slane %v4274_v9, %v6665_v11 }
 0x1e9   : > { %v3761_v15 = vcombine.high %v3745_v6, %v3745_v6  ;;  %v3762_v60 = vcombine.high %v3752_v18, %v3752_v18  ;;  %v3763_v39 = vcombine.high %v3759_v45, %v3759_v45  ;;  %v3780_v54 = vcombine.high %v3778_v38, %v3778_v38 }
 0x1ea   : > { %v4634_v5 = vrot.slane %v4276_v53, %v6665_v11  ;;  %v3787_v50 = vrot.slane %v3771_v19, %v7872_v3  ;;  %v3794_v20 = vrot.slane %v3778_v38, %v7872_v3  ;;  %v3801_v34 = vrot.slane %v3779_v62, %v7872_v3 }
 0x1eb   : > { %v3808_v8 = vrot.slane %v3780_v54, %v7872_v3  ;;  %v4193_v4 = vrot.slane %v4179_v26, %v7872_v3  ;;  %v4194_v24 = vcombine.high %v4186_v23, %v4186_v23  ;;  %v4202_v17 = vrot.slane %v4186_v23, %v7872_v3 }
 0x1ec   : > { %v3809_v51 = vcombine.high %v3787_v50, %v3787_v50  ;;  %v3810_v55 = vcombine.high %v3794_v20, %v3794_v20  ;;  %v3811_v43 = vcombine.high %v3801_v34, %v3801_v34  ;;  %v4899_v7 = vsel %vm1112_vm2, %v3787_v50, %v4606_v42 }
 0x1ed   : > { %v3812_v36 = vcombine.high %v3808_v8, %v3808_v8  ;;  %v4195_v47 = vcombine.high %v4193_v4, %v4193_v4  ;;  %v4209_v30 = vrot.slane %v4193_v4, %v7872_v3  ;;  %v4216_v58 = vrot.slane %v4194_v24, %v7872_v3 }
 0x1ee   : > { %v4224_v19 = vcombine.high %v4202_v17, %v4202_v17  ;;  %v4574_v29 = vrot.slane %v4202_v17, %v6665_v11  ;;  %v4900_v59 = vsel %vm1112_vm2, %v3801_v34, %v4610_v14  ;;  %v4901_v26 = vsel %vm1112_vm2, %v3809_v51, %v4614_v21 }
 0x1ef   : > { %v4223_v23 = vrot.slane %v4195_v47, %v7872_v3  ;;  %v4225_v56 = vcombine.high %v4209_v30, %v4209_v30  ;;  %v4226_v61 = vcombine.high %v4216_v58, %v4216_v58  ;;  %v4578_v32 = vrot.slane %v4216_v58, %v6665_v11 }
 0x1f0   : > { %v4582_v38 = vrot.slane %v4224_v19, %v6665_v11  ;;  %v4590_v62 = vrot.slane %v4209_v30, %v6665_v11  ;;  %v4891_v25 = vsel %vm1112_vm2, %v3738_v44, %v4574_v29  ;;  %v4902_v22 = vsel %vm1112_vm2, %v3811_v43, %v4618_v28 }
 0x1f1   : > { %v4227_v48 = vcombine.high %v4223_v23, %v4223_v23  ;;  %v4586_v49 = vrot.slane %v4226_v61, %v6665_v11  ;;  %v4594_v42 = vrot.slane %v4223_v23, %v6665_v11  ;;  %v4598_v41 = vrot.slane %v4225_v56, %v6665_v11 }
 0x1f2   : > { %v4892_v10 = vsel %vm1112_vm2, %v3752_v18, %v4578_v32  ;;  %v4893_v9 = vsel %vm1112_vm2, %v3760_v12, %v4582_v38  ;;  %v4895_v35 = vsel %vm1112_vm2, %v3745_v6, %v4590_v62  ;;  %v4903_v14 = vsel %vm1112_vm2, %v3794_v20, %v4622_v33 }
 0x1f3   : > { %v4602_v21 = vrot.slane %v4227_v48, %v6665_v11  ;;  %v4894_v44 = vsel %vm1112_vm2, %v3762_v60, %v4586_v49  ;;  %v4896_v53 = vsel %vm1112_vm2, %v3759_v45, %v4594_v42  ;;  %v4897_v28 = vsel %vm1112_vm2, %v3761_v15, %v4598_v41 }
 0x1f4   : > { %v4904_v54 = vsel %vm1112_vm2, %v3808_v8, %v4626_v16  ;;  %v4905_v50 = vsel %vm1112_vm2, %v3810_v55, %v4630_v27  ;;  %v4906_v18 = vsel %vm1112_vm2, %v3812_v36, %v4634_v5  ;;  %v5019_v34 = vcombine.low %v4891_v25, %v4892_v10 }
 0x1f5   : > { %v4898_v12 = vsel %vm1112_vm2, %v3763_v39, %v4602_v21  ;;  %v5020_v6 = vcombine.low %v4893_v9, %v4894_v44  ;;  %v5036_v4 = vcombine.low %v4895_v35, %v4896_v53  ;;  %v5053_v33 = vcombine.low %v4899_v7, %v4900_v59 }
 0x1f6   : > { %v5027_v20 = vrot.slane %v5019_v34, %v6667_v13  ;;  %v5037_v24 = vcombine.low %v4897_v28, %v4898_v12  ;;  %v5054_v60 = vcombine.low %v4901_v26, %v4902_v22  ;;  %v5070_v17 = vcombine.low %v4903_v14, %v4904_v54 }
 0x1f7   : > { %v5034_v45 = vrot.slane %v5020_v6, %v6667_v13  ;;  %v5044_v15 = vrot.slane %v5036_v4, %v6667_v13  ;;  %v5061_v16 = vrot.slane %v5053_v33, %v6667_v13  ;;  %v5071_v27 = vcombine.low %v4905_v50, %v4906_v18 }
 0x1f8   : > { %v5051_v5 = vrot.slane %v5037_v24, %v6667_v13  ;;  %v5068_v39 = vrot.slane %v5054_v60, %v6667_v13  ;;  %v5078_v8 = vrot.slane %v5070_v17, %v6667_v13  ;;  %v3702_v51 = vadd.f32 %v7351_v63, %v7318_v37 }
 0x1f9   : > { %v5035_v55 = vcombine.low %v5027_v20, %v5034_v45  ;;  %v5085_v43 = vrot.slane %v5071_v27, %v6667_v13  ;;  %v3669_v7 = vmul.f32 0.75, %v7294_v52  ;;  %v3677_v36 = vmul.f32 0.25, %v7358_v40 }
 0x1fa   : > { %v5052_v47 = vcombine.low %v5044_v15, %v5051_v5  ;;  %v5069_v30 = vcombine.low %v5061_v16, %v5068_v39  ;;  %v4326_v58 = vcombine.high %v3702_v51, %v3702_v51  ;;  %v4333_v19 = vrot.slane %v3702_v51, %v7872_v3 }
 0x1fb   : > { %v5086_v29 = vcombine.low %v5078_v8, %v5085_v43  ;;  %5307 = vst.msk [vmem:[%s7434_s24] sm:$0xff] %vm2802_vm3, %v5035_v55  ;;  %v3678_v63 = vmul.f32 0.25, %v7354_v2  ;;  %v3685_v52 = vadd.f32 %v3677_v36, %v3669_v7  ;;  %v3693_v40 = vmul.f32 0.25, %v7361_v1 }
 0x1fc   : > { %5308 = vst.msk [vmem:[%s7434_s24 + $0x8] sm:$0xff] %vm2802_vm3, %v5052_v47  ;;  %5309 = vst.msk [vmem:[%s7434_s24 + $0x10] sm:$0xff] %vm2802_vm3, %v5069_v30  ;;  %v4340_v59 = vrot.slane %v4326_v58, %v7872_v3  ;;  %v4341_v26 = vcombine.high %v4333_v19, %v4333_v19  ;;  %v7446_v23 = vrot.slane %v4333_v19, %v7872_v3  ;;  %v3626_v56 = vrot.slane %v7296_v0, 7 }
 0x1fd   : > { %5310 = vst.msk [vmem:[%s7434_s24 + $0x18] sm:$0xff] %vm2802_vm3, %v5086_v29  ;;  %v3686_v61 = vadd.f32 %v3678_v63, %v7318_v37  ;;  %v3701_v2 = vadd.f32 %v3693_v40, %v3669_v7  ;;  %v3813_v32 = vcombine.high %v3685_v52, %v3685_v52  ;;  %v3820_v1 = vrot.slane %v3685_v52, %v7872_v3 }
 0x1fe   : > { %v4342_v38 = vcombine.high %v4340_v59, %v4340_v59  ;;  %v7454_v62 = vrot.slane %v4340_v59, %v7872_v3  ;;  %v7457_v25 = vrot.slane %v4341_v26, %v7872_v3  ;;  %v4371_v22 = vcombine.high %v7446_v23, %v7446_v23 }
 0x1ff   : > { %v4670_v48 = vrot.slane %v7446_v23, %v6665_v11  ;;  %v3827_v49 = vrot.slane %v3813_v32, %v7872_v3  ;;  %v3828_v37 = vcombine.high %v3820_v1, %v3820_v1  ;;  %v3836_v42 = vrot.slane %v3820_v1, %v7872_v3 }
 0x200   : > { %v7466_v41 = vrot.slane %v4342_v38, %v7872_v3  ;;  %v4372_v10 = vcombine.high %v7454_v62, %v7454_v62  ;;  %v4373_v9 = vcombine.high %v7457_v25, %v7457_v25  ;;  %v4674_v35 = vrot.slane %v7457_v25, %v6665_v11 }
 0x201   : > { %v4678_v14 = vrot.slane %v4371_v22, %v6665_v11  ;;  %v4686_v21 = vrot.slane %v7454_v62, %v6665_v11  ;;  %v3829_v44 = vcombine.high %v3827_v49, %v3827_v49  ;;  %v3843_v53 = vrot.slane %v3827_v49, %v7872_v3 }
 0x202   : > { %v4374_v28 = vcombine.high %v7466_v41, %v7466_v41  ;;  %v4682_v54 = vrot.slane %v4373_v9, %v6665_v11  ;;  %v4690_v50 = vrot.slane %v7466_v41, %v6665_v11  ;;  %v4694_v18 = vrot.slane %v4372_v10, %v6665_v11 }
 0x203   : > { %v3850_v34 = vrot.slane %v3828_v37, %v7872_v3  ;;  %v3857_v12 = vrot.slane %v3829_v44, %v7872_v3  ;;  %v3858_v6 = vcombine.high %v3836_v42, %v3836_v42  ;;  %v3859_v4 = vcombine.high %v3843_v53, %v3843_v53 }
 0x204   : > { %v4698_v33 = vrot.slane %v4374_v28, %v6665_v11  ;;  %v3862_v20 = vcombine.high %v3686_v61, %v3686_v61  ;;  %v3869_v24 = vrot.slane %v3686_v61, %v7872_v3  ;;  %v4277_v60 = vcombine.high %v3701_v2, %v3701_v2 }
 0x205   : > { %v3860_v17 = vcombine.high %v3850_v34, %v3850_v34  ;;  %v3861_v45 = vcombine.high %v3857_v12, %v3857_v12  ;;  %v4284_v15 = vrot.slane %v3701_v2, %v7872_v3  ;;  %v3650_v16 = vrot.slane %v7296_v0, 1 }
 0x206   : > { %v3876_v27 = vrot.slane %v3862_v20, %v7872_v3  ;;  %v3877_v5 = vcombine.high %v3869_v24, %v3869_v24  ;;  %v3885_v39 = vrot.slane %v3869_v24, %v7872_v3  ;;  %v4291_v8 = vrot.slane %v4277_v60, %v7872_v3 }
 0x207   : > { %v4292_v51 = vcombine.high %v4284_v15, %v4284_v15  ;;  %v4300_v55 = vrot.slane %v4284_v15, %v7872_v3  ;;  %v3665_v43 = vsel %vm1137_vm1, %v3650_v16, %v7296_v0  ;;  %v7499_v7 = vmul.f32 0.75, %v7296_v0 }
 0x208   : > { %v3878_v36 = vcombine.high %v3876_v27, %v3876_v27  ;;  %v3892_v47 = vrot.slane %v3876_v27, %v7872_v3  ;;  %v3899_v30 = vrot.slane %v3877_v5, %v7872_v3  ;;  %v3907_v58 = vcombine.high %v3885_v39, %v3885_v39 }
 0x209   : > { %v4293_v19 = vcombine.high %v4291_v8, %v4291_v8  ;;  %v4307_v29 = vrot.slane %v4291_v8, %v7872_v3  ;;  %v4314_v63 = vrot.slane %v4292_v51, %v7872_v3  ;;  %v4322_v52 = vcombine.high %v4300_v55, %v4300_v55 }
 0x20a   : > { %v3906_v40 = vrot.slane %v3878_v36, %v7872_v3  ;;  %v3908_v59 = vcombine.high %v3892_v47, %v3892_v47  ;;  %v3909_v26 = vcombine.high %v3899_v30, %v3899_v30  ;;  %v4638_v61 = vrot.slane %v4300_v55, %v6665_v11 }
 0x20b   : > { %v4321_v2 = vrot.slane %v4293_v19, %v7872_v3  ;;  %v4323_v32 = vcombine.high %v4307_v29, %v4307_v29  ;;  %v4324_v1 = vcombine.high %v4314_v63, %v4314_v63  ;;  %v4642_v38 = vrot.slane %v4314_v63, %v6665_v11 }
 0x20c   : > { %v3910_v25 = vcombine.high %v3906_v40, %v3906_v40  ;;  %v4646_v22 = vrot.slane %v4322_v52, %v6665_v11  ;;  %v4654_v49 = vrot.slane %v4307_v29, %v6665_v11  ;;  %v4907_v37 = vsel %vm1112_vm2, %v3836_v42, %v4638_v61 }
 0x20d   : > { %v4325_v41 = vcombine.high %v4321_v2, %v4321_v2  ;;  %v4650_v10 = vrot.slane %v4324_v1, %v6665_v11  ;;  %v4658_v9 = vrot.slane %v4321_v2, %v6665_v11  ;;  %v4662_v44 = vrot.slane %v4323_v32, %v6665_v11  ;;  %v3601_v1 = vpop.f32.mrf.mxu1 }
 0x20e   : > { %v4908_v28 = vsel %vm1112_vm2, %v3850_v34, %v4642_v38  ;;  %v4909_v20 = vsel %vm1112_vm2, %v3858_v6, %v4646_v22  ;;  %v4911_v24 = vsel %vm1112_vm2, %v3843_v53, %v4654_v49  ;;  %v4915_v60 = vsel %vm1112_vm2, %v3885_v39, %v4670_v48 }
 0x20f   : > { %v4666_v42 = vrot.slane %v4325_v41, %v6665_v11  ;;  %v4910_v15 = vsel %vm1112_vm2, %v3860_v17, %v4650_v10  ;;  %v4912_v27 = vsel %vm1112_vm2, %v3857_v12, %v4658_v9  ;;  %v4913_v5 = vsel %vm1112_vm2, %v3859_v4, %v4662_v44 }
 0x210   : > { %v4916_v8 = vsel %vm1112_vm2, %v3899_v30, %v4674_v35  ;;  %v4917_v34 = vsel %vm1112_vm2, %v3907_v58, %v4678_v14  ;;  %v4918_v6 = vsel %vm1112_vm2, %v3909_v26, %v4682_v54  ;;  %v4919_v23 = vsel %vm1112_vm2, %v3892_v47, %v4686_v21 }
 0x211   : > { %v4914_v48 = vsel %vm1112_vm2, %v3861_v45, %v4666_v42  ;;  %v4920_v53 = vsel %vm1112_vm2, %v3906_v40, %v4690_v50  ;;  %v4921_v17 = vsel %vm1112_vm2, %v3908_v59, %v4694_v18  ;;  %v4922_v12 = vsel %vm1112_vm2, %v3910_v25, %v4698_v33 }
 0x212   : > { %v5087_v4 = vcombine.low %v4907_v37, %v4908_v28  ;;  %v5088_v39 = vcombine.low %v4909_v20, %v4910_v15  ;;  %v5104_v35 = vcombine.low %v4911_v24, %v4912_v27  ;;  %v5105_v51 = vcombine.low %v4913_v5, %v4914_v48 }
 0x213   : > { %v5121_v14 = vcombine.low %v4915_v60, %v4916_v8  ;;  %v5122_v55 = vcombine.low %v4917_v34, %v4918_v6  ;;  %v5138_v54 = vcombine.low %v4919_v23, %v4920_v53  ;;  %v5139_v36 = vcombine.low %v4921_v17, %v4922_v12 }
 0x214   : > { %v5095_v62 = vrot.slane %v5087_v4, %v6667_v13  ;;  %v5102_v21 = vrot.slane %v5088_v39, %v6667_v13  ;;  %v5112_v50 = vrot.slane %v5104_v35, %v6667_v13  ;;  %v5119_v18 = vrot.slane %v5105_v51, %v6667_v13 }
 0x215   : > { %v5129_v33 = vrot.slane %v5121_v14, %v6667_v13  ;;  %v5136_v45 = vrot.slane %v5122_v55, %v6667_v13  ;;  %v5146_v47 = vrot.slane %v5138_v54, %v6667_v13  ;;  %v5153_v30 = vrot.slane %v5139_v36, %v6667_v13 }
 0x216   : > { %v5103_v58 = vcombine.low %v5095_v62, %v5102_v21  ;;  %v5120_v19 = vcombine.low %v5112_v50, %v5119_v18  ;;  %v3696_v29 = vmul.f32 0.25, %v3665_v43  ;;  %v3625_v63 = vrot.slane %v7298_v57, 7 }
 0x217   : > { %v5137_v52 = vcombine.low %v5129_v33, %v5136_v45  ;;  %v5154_v40 = vcombine.low %v5146_v47, %v5153_v30  ;;  %v3649_v59 = vrot.slane %v7298_v57, 1  ;;  %v3671_v26 = vmul.f32 0.75, %v7298_v57 }
 0x218   : > { %5311 = vst.msk [vmem:[%s7434_s24 + $0x20] sm:$0xff] %vm2802_vm3, %v5103_v58  ;;  %5312 = vst.msk [vmem:[%s7434_s24 + $0x28] sm:$0xff] %vm2802_vm3, %v5120_v19  ;;  %v3704_v61 = vadd.f32 %v3696_v29, %v7499_v7  ;;  %v3627_v2 = vsel %vm1112_vm2, %v3625_v63, %v3626_v56  ;;  %v3641_v43 = vsel %vm1112_vm2, %v7298_v57, %v3625_v63  ;;  %v3629_v32 = vrot.slane %v7300_v46, 7 }
 0x219   : > { %5313 = vst.msk [vmem:[%s7434_s24 + $0x30] sm:$0xff] %vm2802_vm3, %v5137_v52  ;;  %5314 = vst.msk [vmem:[%s7434_s24 + $0x38] sm:$0xff] %vm2802_vm3, %v5154_v40  ;;  %v3651_v38 = vsel %vm1137_vm1, %v3649_v59, %v3650_v16  ;;  %v3679_v25 = vmul.f32 0.25, %v3641_v43  ;;  %v3680_v22 = vmul.f32 0.25, %v3627_v2  ;;  %v3653_v49 = vrot.slane %v7300_v46, 1 }
 0x21a   : > { %v4424_v37 = vcombine.high %v3704_v61, %v3704_v61  ;;  %v4431_v56 = vrot.slane %v3704_v61, %v7872_v3  ;;  %v3695_v41 = vmul.f32 0.25, %v3651_v38  ;;  %v7569_v57 = vmul.f32 0.75, %v7300_v46 }
 0x21b   : > { %v3687_v10 = vadd.f32 %v3679_v25, %v3671_v26  ;;  %v3688_v9 = vadd.f32 %v3680_v22, %v7499_v7  ;;  %v7576_v0 = vsel %vm1137_vm1, %v3653_v49, %v7300_v46  ;;  %v7579_v16 = vadd.f32 %v3601_v1, %v7290_v31 }
 0x21c   : > { %v4438_v44 = vrot.slane %v4424_v37, %v7872_v3  ;;  %v4439_v28 = vcombine.high %v4431_v56, %v4431_v56  ;;  %v4447_v20 = vrot.slane %v4431_v56, %v7872_v3  ;;  %v3703_v24 = vadd.f32 %v3695_v41, %v3671_v26 }
 0x21d   : > { %v3911_v60 = vcombine.high %v3687_v10, %v3687_v10  ;;  %v3918_v42 = vrot.slane %v3687_v10, %v7872_v3  ;;  %v3960_v15 = vcombine.high %v3688_v9, %v3688_v9  ;;  %v3967_v7 = vrot.slane %v3688_v9, %v7872_v3 }
 0x21e   : > { %v4440_v27 = vcombine.high %v4438_v44, %v4438_v44  ;;  %v4454_v5 = vrot.slane %v4438_v44, %v7872_v3  ;;  %v4461_v8 = vrot.slane %v4439_v28, %v7872_v3  ;;  %v4469_v34 = vcombine.high %v4447_v20, %v4447_v20 }
 0x21f   : > { %v4734_v31 = vrot.slane %v4447_v20, %v6665_v11  ;;  %v3925_v6 = vrot.slane %v3911_v60, %v7872_v3  ;;  %v3926_v23 = vcombine.high %v3918_v42, %v3918_v42  ;;  %v3934_v48 = vrot.slane %v3918_v42, %v7872_v3 }
 0x220   : > { %v4468_v53 = vrot.slane %v4440_v27, %v7872_v3  ;;  %v4470_v17 = vcombine.high %v4454_v5, %v4454_v5  ;;  %v4471_v12 = vcombine.high %v4461_v8, %v4461_v8  ;;  %v4738_v4 = vrot.slane %v4461_v8, %v6665_v11 }
 0x221   : > { %v4742_v39 = vrot.slane %v4469_v34, %v6665_v11  ;;  %v4750_v35 = vrot.slane %v4454_v5, %v6665_v11  ;;  %v3927_v51 = vcombine.high %v3925_v6, %v3925_v6  ;;  %v3941_v14 = vrot.slane %v3925_v6, %v7872_v3 }
 0x222   : > { %v4472_v55 = vcombine.high %v4468_v53, %v4468_v53  ;;  %v4746_v54 = vrot.slane %v4471_v12, %v6665_v11  ;;  %v4754_v36 = vrot.slane %v4468_v53, %v6665_v11  ;;  %v4758_v62 = vrot.slane %v4470_v17, %v6665_v11 }
 0x223   : > { %v3948_v21 = vrot.slane %v3926_v23, %v7872_v3  ;;  %v3955_v50 = vrot.slane %v3927_v51, %v7872_v3  ;;  %v3956_v18 = vcombine.high %v3934_v48, %v3934_v48  ;;  %v3957_v33 = vcombine.high %v3941_v14, %v3941_v14 }
 0x224   : > { %v4762_v45 = vrot.slane %v4472_v55, %v6665_v11  ;;  %v3974_v47 = vrot.slane %v3960_v15, %v7872_v3  ;;  %v3975_v30 = vcombine.high %v3967_v7, %v3967_v7  ;;  %v3983_v58 = vrot.slane %v3967_v7, %v7872_v3 }
 0x225   : > { %v3958_v19 = vcombine.high %v3948_v21, %v3948_v21  ;;  %v3959_v29 = vcombine.high %v3955_v50, %v3955_v50  ;;  %v4375_v63 = vcombine.high %v3703_v24, %v3703_v24  ;;  %v4382_v52 = vrot.slane %v3703_v24, %v7872_v3 }
 0x226   : > { %v3976_v40 = vcombine.high %v3974_v47, %v3974_v47  ;;  %v3990_v59 = vrot.slane %v3974_v47, %v7872_v3  ;;  %v3997_v26 = vrot.slane %v3975_v30, %v7872_v3  ;;  %v4005_v61 = vcombine.high %v3983_v58, %v3983_v58 }
 0x227   : > { %v4389_v2 = vrot.slane %v4375_v63, %v7872_v3  ;;  %v4390_v43 = vcombine.high %v4382_v52, %v4382_v52  ;;  %v4398_v1 = vrot.slane %v4382_v52, %v7872_v3  ;;  %v4931_v38 = vsel %vm1112_vm2, %v3983_v58, %v4734_v31 }
 0x228   : > { %v4004_v25 = vrot.slane %v3976_v40, %v7872_v3  ;;  %v4006_v22 = vcombine.high %v3990_v59, %v3990_v59  ;;  %v4007_v37 = vcombine.high %v3997_v26, %v3997_v26  ;;  %v4932_v56 = vsel %vm1112_vm2, %v3997_v26, %v4738_v4 }
 0x229   : > { %v4391_v41 = vcombine.high %v4389_v2, %v4389_v2  ;;  %v4405_v10 = vrot.slane %v4389_v2, %v7872_v3  ;;  %v4412_v9 = vrot.slane %v4390_v43, %v7872_v3  ;;  %v4420_v44 = vcombine.high %v4398_v1, %v4398_v1 }
 0x22a   : > { %v4008_v28 = vcombine.high %v4004_v25, %v4004_v25  ;;  %v4702_v20 = vrot.slane %v4398_v1, %v6665_v11  ;;  %v4933_v24 = vsel %vm1112_vm2, %v4005_v61, %v4742_v39  ;;  %v4934_v60 = vsel %vm1112_vm2, %v4007_v37, %v4746_v54 }
 0x22b   : > { %v4419_v42 = vrot.slane %v4391_v41, %v7872_v3  ;;  %v4421_v15 = vcombine.high %v4405_v10, %v4405_v10  ;;  %v4422_v7 = vcombine.high %v4412_v9, %v4412_v9  ;;  %v4706_v27 = vrot.slane %v4412_v9, %v6665_v11 }
 0x22c   : > { %v4710_v5 = vrot.slane %v4420_v44, %v6665_v11  ;;  %v4718_v8 = vrot.slane %v4405_v10, %v6665_v11  ;;  %v4923_v34 = vsel %vm1112_vm2, %v3934_v48, %v4702_v20  ;;  %v4935_v31 = vsel %vm1112_vm2, %v3990_v59, %v4750_v35 }
 0x22d   : > { %v4423_v6 = vcombine.high %v4419_v42, %v4419_v42  ;;  %v4714_v23 = vrot.slane %v4422_v7, %v6665_v11  ;;  %v4722_v53 = vrot.slane %v4419_v42, %v6665_v11  ;;  %v4726_v17 = vrot.slane %v4421_v15, %v6665_v11 }
 0x22e   : > { %v4924_v12 = vsel %vm1112_vm2, %v3948_v21, %v4706_v27  ;;  %v4925_v4 = vsel %vm1112_vm2, %v3956_v18, %v4710_v5  ;;  %v4927_v39 = vsel %vm1112_vm2, %v3941_v14, %v4718_v8  ;;  %v4936_v51 = vsel %vm1112_vm2, %v4004_v25, %v4754_v36 }
 0x22f   : > { %v4730_v55 = vrot.slane %v4423_v6, %v6665_v11  ;;  %v4926_v48 = vsel %vm1112_vm2, %v3958_v19, %v4714_v23  ;;  %v4928_v35 = vsel %vm1112_vm2, %v3955_v50, %v4722_v53  ;;  %v4929_v54 = vsel %vm1112_vm2, %v3957_v33, %v4726_v17 }
 0x230   : > { %v4937_v47 = vsel %vm1112_vm2, %v4006_v22, %v4758_v62  ;;  %v4938_v30 = vsel %vm1112_vm2, %v4008_v28, %v4762_v45  ;;  %v5155_v58 = vcombine.low %v4923_v34, %v4924_v12  ;;  %v5156_v21 = vcombine.low %v4925_v4, %v4926_v48 }
 0x231   : > { %v4930_v18 = vsel %vm1112_vm2, %v3959_v29, %v4730_v55  ;;  %v5172_v63 = vcombine.low %v4927_v39, %v4928_v35  ;;  %v5189_v14 = vcombine.low %v4931_v38, %v4932_v56  ;;  %v5190_v52 = vcombine.low %v4933_v24, %v4934_v60 }
 0x232   : > { %v5163_v36 = vrot.slane %v5155_v58, %v6667_v13  ;;  %v5170_v40 = vrot.slane %v5156_v21, %v6667_v13  ;;  %v5173_v19 = vcombine.low %v4929_v54, %v4930_v18  ;;  %v5206_v50 = vcombine.low %v4935_v31, %v4936_v51 }
 0x233   : > { %v5180_v33 = vrot.slane %v5172_v63, %v6667_v13  ;;  %v5197_v62 = vrot.slane %v5189_v14, %v6667_v13  ;;  %v5204_v45 = vrot.slane %v5190_v52, %v6667_v13  ;;  %v5207_v59 = vcombine.low %v4937_v47, %v4938_v30 }
 0x234   : > { %v5171_v26 = vcombine.low %v5163_v36, %v5170_v40  ;;  %v5187_v29 = vrot.slane %v5173_v19, %v6667_v13  ;;  %v5214_v61 = vrot.slane %v5206_v50, %v6667_v13  ;;  %v3698_v2 = vmul.f32 0.25, %v7576_v0 }
 0x235   : > { %v5205_v43 = vcombine.low %v5197_v62, %v5204_v45  ;;  %v5221_v1 = vrot.slane %v5207_v59, %v6667_v13  ;;  %v3628_v38 = vrot.slane %v7579_v16, 7  ;;  %v3652_v25 = vrot.slane %v7579_v16, 1 }
 0x236   : > { %v5188_v22 = vcombine.low %v5180_v33, %v5187_v29  ;;  %5315 = vst.msk [vmem:[%s7434_s24 + $0x40] sm:$0xff] %vm2802_vm3, %v5171_v26  ;;  %v3706_v37 = vadd.f32 %v3698_v2, %v7569_v57  ;;  %v3673_v56 = vmul.f32 0.75, %v7579_v16 }
 0x237   : > { %v5222_v41 = vcombine.low %v5214_v61, %v5221_v1  ;;  %5317 = vst.msk [vmem:[%s7434_s24 + $0x50] sm:$0xff] %vm2802_vm3, %v5205_v43  ;;  %v3630_v0 = vsel %vm1112_vm2, %v3628_v38, %v3629_v32  ;;  %v3642_v10 = vsel %vm1112_vm2, %v7579_v16, %v3628_v38  ;;  %v3654_v9 = vsel %vm1137_vm1, %v3652_v25, %v3653_v49 }
 0x238   : > { %5316 = vst.msk [vmem:[%s7434_s24 + $0x48] sm:$0xff] %vm2802_vm3, %v5188_v22  ;;  %v4522_v44 = vcombine.high %v3706_v37, %v3706_v37  ;;  %v4529_v28 = vrot.slane %v3706_v37, %v7872_v3  ;;  %v3681_v20 = vmul.f32 0.25, %v3642_v10  ;;  %v3682_v24 = vmul.f32 0.25, %v3630_v0 }
 0x239   : > { %5318 = vst.msk [vmem:[%s7434_s24 + $0x58] sm:$0xff] %vm2802_vm3, %v5222_v41  ;;  %v3697_v60 = vmul.f32 0.25, %v3654_v9 }
 0x23a   : > { %v4536_v42 = vrot.slane %v4522_v44, %v7872_v3  ;;  %v4537_v32 = vcombine.high %v4529_v28, %v4529_v28  ;;  %v4545_v15 = vrot.slane %v4529_v28, %v7872_v3  ;;  %v3689_v16 = vadd.f32 %v3681_v20, %v3673_v56 }
 0x23b   : > { %v3690_v46 = vadd.f32 %v3682_v24, %v7569_v57  ;;  %v3705_v34 = vadd.f32 %v3697_v60, %v3673_v56 }
 0x23c   : > { %v4538_v7 = vcombine.high %v4536_v42, %v4536_v42  ;;  %v7670_v49 = vrot.slane %v4536_v42, %v7872_v3  ;;  %v4559_v27 = vrot.slane %v4537_v32, %v7872_v3  ;;  %v4567_v5 = vcombine.high %v4545_v15, %v4545_v15 }
 0x23d   : > { %v4798_v8 = vrot.slane %v4545_v15, %v6665_v11  ;;  %v4009_v31 = vcombine.high %v3689_v16, %v3689_v16  ;;  %v4016_v6 = vrot.slane %v3689_v16, %v7872_v3  ;;  %v4058_v17 = vcombine.high %v3690_v46, %v3690_v46 }
 0x23e   : > { %v7676_v23 = vrot.slane %v4538_v7, %v7872_v3  ;;  %v4568_v53 = vcombine.high %v7670_v49, %v7670_v49  ;;  %v4569_v57 = vcombine.high %v4559_v27, %v4559_v27  ;;  %v4802_v12 = vrot.slane %v4559_v27, %v6665_v11 }
 0x23f   : > { %v4806_v4 = vrot.slane %v4567_v5, %v6665_v11  ;;  %v4023_v39 = vrot.slane %v4009_v31, %v7872_v3  ;;  %v4024_v51 = vcombine.high %v4016_v6, %v4016_v6  ;;  %v4814_v35 = vrot.slane %v7670_v49, %v6665_v11 }
 0x240   : > { %v4570_v55 = vcombine.high %v7676_v23, %v7676_v23  ;;  %v4810_v48 = vrot.slane %v4569_v57, %v6665_v11  ;;  %v4818_v54 = vrot.slane %v7676_v23, %v6665_v11  ;;  %v4032_v30 = vrot.slane %v4016_v6, %v7872_v3 }
 0x241   : > { %v4025_v47 = vcombine.high %v4023_v39, %v4023_v39  ;;  %v4039_v58 = vrot.slane %v4023_v39, %v7872_v3  ;;  %v4046_v21 = vrot.slane %v4024_v51, %v7872_v3  ;;  %v4822_v18 = vrot.slane %v4568_v53, %v6665_v11 }
 0x242   : > { %v4065_v63 = vrot.slane %v3690_v46, %v7872_v3  ;;  %v4072_v14 = vrot.slane %v4058_v17, %v7872_v3  ;;  %v4473_v52 = vcombine.high %v3705_v34, %v3705_v34  ;;  %v4826_v36 = vrot.slane %v4570_v55, %v6665_v11 }
 0x243   : > { %v4053_v40 = vrot.slane %v4025_v47, %v7872_v3  ;;  %v4054_v19 = vcombine.high %v4032_v30, %v4032_v30  ;;  %v4055_v50 = vcombine.high %v4039_v58, %v4039_v58  ;;  %v4056_v26 = vcombine.high %v4046_v21, %v4046_v21 }
 0x244   : > { %v4073_v33 = vcombine.high %v4065_v63, %v4065_v63  ;;  %v4074_v62 = vcombine.high %v4072_v14, %v4072_v14  ;;  %v4081_v45 = vrot.slane %v4065_v63, %v7872_v3  ;;  %v4088_v59 = vrot.slane %v4072_v14, %v7872_v3 }
 0x245   : > { %v4057_v29 = vcombine.high %v4053_v40, %v4053_v40  ;;  %v4480_v61 = vrot.slane %v3705_v34, %v7872_v3  ;;  %v4487_v2 = vrot.slane %v4473_v52, %v7872_v3 }
 0x246   : > { %v4095_v43 = vrot.slane %v4073_v33, %v7872_v3  ;;  %v4102_v1 = vrot.slane %v4074_v62, %v7872_v3  ;;  %v4103_v38 = vcombine.high %v4081_v45, %v4081_v45  ;;  %v4104_v25 = vcombine.high %v4088_v59, %v4088_v59 }
 0x247   : > { %v4488_v22 = vcombine.high %v4480_v61, %v4480_v61  ;;  %v4489_v37 = vcombine.high %v4487_v2, %v4487_v2  ;;  %v4496_v56 = vrot.slane %v4480_v61, %v7872_v3  ;;  %v4503_v41 = vrot.slane %v4487_v2, %v7872_v3 }
 0x248   : > { %v4105_v0 = vcombine.high %v4095_v43, %v4095_v43  ;;  %v4106_v10 = vcombine.high %v4102_v1, %v4102_v1  ;;  %v4947_v9 = vsel %vm1112_vm2, %v4081_v45, %v4798_v8  ;;  %v4948_v44 = vsel %vm1112_vm2, %v4095_v43, %v4802_v12 }
 0x249   : > { %v4510_v28 = vrot.slane %v4488_v22, %v7872_v3  ;;  %v4517_v20 = vrot.slane %v4489_v37, %v7872_v3  ;;  %v4518_v24 = vcombine.high %v4496_v56, %v4496_v56  ;;  %v4519_v60 = vcombine.high %v4503_v41, %v4503_v41 }
 0x24a   : > { %v4766_v42 = vrot.slane %v4496_v56, %v6665_v11  ;;  %v4782_v32 = vrot.slane %v4503_v41, %v6665_v11  ;;  %v4949_v15 = vsel %vm1112_vm2, %v4103_v38, %v4806_v4  ;;  %v4950_v16 = vsel %vm1112_vm2, %v4105_v0, %v4810_v48 }
 0x24b   : > { %v4520_v46 = vcombine.high %v4510_v28, %v4510_v28  ;;  %v4521_v7 = vcombine.high %v4517_v20, %v4517_v20  ;;  %v4770_v49 = vrot.slane %v4510_v28, %v6665_v11  ;;  %v4774_v27 = vrot.slane %v4518_v24, %v6665_v11 }
 0x24c   : > { %v4786_v5 = vrot.slane %v4517_v20, %v6665_v11  ;;  %v4790_v3 = vrot.slane %v4519_v60, %v6665_v11  ;;  %v4939_v8 = vsel %vm1112_vm2, %v4032_v30, %v4766_v42  ;;  %v4943_v34 = vsel %vm1112_vm2, %v4039_v58, %v4782_v32 }
 0x24d   : > { %v4778_v31 = vrot.slane %v4520_v46, %v6665_v11  ;;  %v4794_v6 = vrot.slane %v4521_v7, %v6665_v11  ;;  %v4940_v23 = vsel %vm1112_vm2, %v4046_v21, %v4770_v49  ;;  %v4941_v53 = vsel %vm1112_vm2, %v4054_v19, %v4774_v27 }
 0x24e   : > { %v4944_v57 = vsel %vm1112_vm2, %v4053_v40, %v4786_v5  ;;  %v4945_v17 = vsel %vm1112_vm2, %v4055_v50, %v4790_v3  ;;  %v4951_v12 = vsel %vm1112_vm2, %v4088_v59, %v4814_v35  ;;  %v4952_v4 = vsel %vm1112_vm2, %v4102_v1, %v4818_v54 }
 0x24f   : > { %v4942_v39 = vsel %vm1112_vm2, %v4056_v26, %v4778_v31  ;;  %v4946_v51 = vsel %vm1112_vm2, %v4057_v29, %v4794_v6  ;;  %v4953_v55 = vsel %vm1112_vm2, %v4104_v25, %v4822_v18  ;;  %v4954_v11 = vsel %vm1112_vm2, %v4106_v10, %v4826_v36 }
 0x250   : > { %v5223_v48 = vcombine.low %v4939_v8, %v4940_v23  ;;  %v5224_v47 = vcombine.low %v4941_v53, %v4942_v39  ;;  %v5240_v30 = vcombine.low %v4943_v34, %v4944_v57  ;;  %v5241_v58 = vcombine.low %v4945_v17, %v4946_v51 }
 0x251   : > { %v5257_v21 = vcombine.low %v4947_v9, %v4948_v44  ;;  %v5258_v63 = vcombine.low %v4949_v15, %v4950_v16  ;;  %v5274_v14 = vcombine.low %v4951_v12, %v4952_v4  ;;  %v5275_v35 = vcombine.low %v4953_v55, %v4954_v11 }
 0x252   : > { %v5231_v54 = vrot.slane %v5223_v48, %v6667_v13  ;;  %v5238_v52 = vrot.slane %v5224_v47, %v6667_v13  ;;  %v5248_v18 = vrot.slane %v5240_v30, %v6667_v13  ;;  %v5255_v36 = vrot.slane %v5241_v58, %v6667_v13 }
 0x253   : > { %v5265_v40 = vrot.slane %v5257_v21, %v6667_v13  ;;  %v5272_v19 = vrot.slane %v5258_v63, %v6667_v13  ;;  %v5282_v50 = vrot.slane %v5274_v14, %v6667_v13  ;;  %v5289_v33 = vrot.slane %v5275_v35, %v6667_v13 }
 0x254   : > { %v5239_v62 = vcombine.low %v5231_v54, %v5238_v52  ;;  %v5256_v45 = vcombine.low %v5248_v18, %v5255_v36 }
 0x255   : > { %v5273_v59 = vcombine.low %v5265_v40, %v5272_v19  ;;  %v5290_v26 = vcombine.low %v5282_v50, %v5289_v33 }
 0x256   : > { %5319 = vst.msk [vmem:[%s7434_s24 + $0x60] sm:$0xff] %vm2802_vm3, %v5239_v62  ;;  %5320 = vst.msk [vmem:[%s7434_s24 + $0x68] sm:$0xff] %vm2802_vm3, %v5256_v45 }
 0x257   : > { %5321 = vst.msk [vmem:[%s7434_s24 + $0x70] sm:$0xff] %vm2802_vm3, %v5273_v59  ;;  %5322 = vst.msk [vmem:[%s7434_s24 + $0x78] sm:$0xff] %vm2802_vm3, %v5290_v26 }
 0x258   : > { %6072 = shalt.err (!%p6069_p3)
}
 0x259   : > { %s6073_s25 = scalar_lea.hbm %s7746_s13, 2048  ;;  %s6077_s14 = scalar_lea.hbm %s7809_s4, 4096 }
 0x25a   : > { %p6074_p5 = scmp.ne.s32.totalorder %s7746_s13, %s6073_s25  ;;  %p6078_p4 = scmp.lt.s32.totalorder %s7746_s13, %s7809_s4 }
 0x25b   : > { %p6079_p7 = scmp.lt.s32.totalorder %s6077_s14, %s6073_s25 }
 0x25c   : > { %p6075_p10 = pnand %p6074_p5, %p7871_p12 }
 0x25d   : > { %p6080_p11 = por %p6079_p7, %p6078_p4 }
 0x25e   : > { %p6076_p0 = pneg %p6075_p10 }
 0x260   : > { %p6081_p13 = pnand %p6080_p11, %p6076_p0 }
 0x262   : > { %6084 = shalt.err (!%p6081_p13)
}
 0x263   : > { %5871 = dma.vmem_to_hbm [thread:$0]  (%p7871_p12), %s7748_s5, 2048, %s7746_s13, %s5329_s11, %s6157_s9, %s6157_s9, %s6158_s12  }
 0x264 PF: > { %s5379_s29 = sand.u32 1, %s6127_s15   ;;  %p7873_p2 = scmp.ne.s32.totalorder %s7820_s6, 0 }
 0x265   : > { %p7874_p8 = scmp.ge.s32.totalorder %s6147_s20, 2  ;;  %s5380_s7 = scalar_lea.sflag [#allocation4], %s5379_s29 }
 0x267   : > { %p5886_p1 = pnand %p7874_p8, %p7873_p2 }
 0x269   : > { %p5887_p6 = pneg %p5886_p1 }
 0x26b   : > { %6118 = dma.done.wait (%p5887_p6), %s5380_s7, 2048  }
 0x26c   : > { %6120 = vsyncadd (%p5887_p6), %s5380_s7, 4294965248  ;;  %s5389_s18 = scalar_lea.sflag [#allocation10], %s5379_s29 }
 0x26d   : > { %6122 = dma.done.wait (%p5887_p6), %s5389_s18, 2048  }
 0x26e   : > { %6124 = vsyncadd (%p5887_p6), %s5389_s18, 4294965248  ;;  %s25_s20 = sadd.s32 1, %s6147_s20   ;;  %s7875_s15 = smov %s6131_s16 }
 0x26f   : > { %p22_p9 = scmp.ge.s32.totalorder %s25_s20, 4   ;;  %s7876_s16 = smov %s6135_s17 }
 0x270   : > { %s7877_s17 = smov %s6236_s27  ;;  %s7878_s18 = smov %s6143_s19 }
 0x271   : > { %s7879_s19 = smov %s7881_s21  ;;  %24 = sbr.rel (!%p22_p9) target bundleno = 9 (0x9), region = 110 }
 0x276   :  { %5394 = vsyncpa [#allocation3], 1 }
 0x277   :  { %5396 = vsyncpa [#allocation3 + $0x1], 1 }
 0x278   :  { %5397 = vsyncpa [#allocation6], 1 }
 0x279   :  { %5399 = vsyncpa [#allocation6 + $0x1], 1 }
 0x27a   :  { %5400 = vsyncpa [#allocation4], 1 }
 0x27b   :  { %5402 = vsyncpa [#allocation4 + $0x1], 1 }
 0x27c   :  { %5403 = vsyncpa [#allocation10], 1 }
 0x27d   :  { %5405 = vsyncpa [#allocation10 + $0x1], 1 }

</bundles_post_ra>
